<compile_context>
chip_gen: v6e
topology: v6e:2x2x1
jax: 0.10.0
libtpu: 0.0.40
codegen_flags: <defaults>
</compile_context>

<pallas_src>
import jax
import jax.numpy as jnp
from jax.experimental import pallas as pl
from jax.experimental.pallas import tpu as pltpu


# --------------------------------------------------------------------------- #
# Kernel
# --------------------------------------------------------------------------- #
def vae_kernel(x_ref, eps_ref,
               w1_ref, w2_ref, wh_ref, wd1_ref, wd2_ref, wd3_ref,
               b_ref,
               out_ref, heads_ref):
    latent = eps_ref.shape[-1]

    def dense(act_bf16, w_ref, bias_row, relu):
        out_w = w_ref.shape[-1]
        y = jnp.dot(act_bf16, w_ref[...],
                    preferred_element_type=jnp.float32)
        y = y + b_ref[bias_row:bias_row + 1, :out_w]        # [1, out_w] f32
        if relu:
            # single bf16 cast right after the ReLU -> bf16 intermediates
            return jnp.maximum(y, 0.0).astype(jnp.bfloat16)
        return y                                            # f32 (head / final)

    x = x_ref[...]
    if x.dtype != jnp.bfloat16:          # no-op when the producer emits bf16
        x = x.astype(jnp.bfloat16)

    # encoder: Linear(input_dim,256)+ReLU, Linear(256,128)+ReLU
    h = dense(x, w1_ref, 0, relu=True)                      # [TB, 256] bf16
    h = dense(h, w2_ref, 1, relu=True)                      # [TB, 128] bf16

    # fused mu|logvar head, zero-padded to a lane-dense width (>=128)
    heads = dense(h, wh_ref, 2, relu=False)                 # [TB, head_pad] f32
    mu = heads[:, :latent]
    logvar = heads[:, latent:2 * latent]

    # reparameterization: z = mu + eps * exp(0.5 * logvar)
    z = mu + eps_ref[...] * jnp.exp(0.5 * logvar)           # f32
    z = z.astype(jnp.bfloat16)

    # decoder: Linear(latent,128)+ReLU, Linear(128,256)+ReLU, Linear(256,input_dim)
    d = dense(z, wd1_ref, 3, relu=True)                     # [TB, 128] bf16
    d = dense(d, wd2_ref, 4, relu=True)                     # [TB, 256] bf16
    out = dense(d, wd3_ref, 5, relu=False)                  # [TB, input_dim] f32

    out_ref[...] = out.astype(out_ref.dtype)                # bf16 writeback
    heads_ref[...] = heads                                  # lane-dense f32 store


# --------------------------------------------------------------------------- #
# Wrapper
# --------------------------------------------------------------------------- #
def vae_forward(x, eps, weights, biases_packed, *,
                batch_tile=512, out_dtype=jnp.bfloat16):
    """x: [B, input_dim] (bf16 preferred), eps: [B, latent] f32,
    weights: (w1, w2, wh_padded, wd1, wd2, wd3) bf16, pre-transposed [in, out],
    biases_packed: [6, width] f32 (rows: b1, b2, bh, bd1, bd2, bd3)."""
    B, input_dim = x.shape
    latent_dim = eps.shape[1]
    w1, w2, wh, wd1, wd2, wd3 = weights
    head_pad = wh.shape[1]

    # ---- batch tile selection ---------------------------------------------
    tb = min(batch_tile, B)
    if pl.cdiv(B, tb) < 2 and B > 8:
        tb = (B + 1) // 2            # keep >=2 grid steps for v7x's 2 TCs
    if tb != B:
        tb = max(8, (tb // 8) * 8)   # sublane alignment for partial blocks
    grid = (pl.cdiv(B, tb),)         # ragged tail handled by block padding

    def act_spec(feat):
        # batch-tiled activations / outputs
        return pl.BlockSpec((tb, feat), lambda i: (i, 0))

    def resident_spec(arr):
        # whole-array block, same block index every grid step -> DMA'd once,
        # stays VMEM-resident across batch tiles.
        return pl.BlockSpec(arr.shape, lambda i: (0, 0))

    in_specs = [
        act_spec(input_dim),                 # x
        act_spec(latent_dim),                # eps
        resident_spec(w1), resident_spec(w2), resident_spec(wh),
        resident_spec(wd1), resident_spec(wd2), resident_spec(wd3),
        resident_spec(biases_packed),        # packed biases
    ]
    out_specs = [
        act_spec(input_dim),                 # reconstruction
        act_spec(head_pad),                  # fused mu|logvar (lane-padded)
    ]
    out_shapes = (
        jax.ShapeDtypeStruct((B, input_dim), out_dtype),
        jax.ShapeDtypeStruct((B, head_pad), jnp.float32),
    )

    out, heads = pl.pallas_call(
        vae_kernel,
        grid=grid,
        in_specs=in_specs,
        out_specs=out_specs,
        out_shape=out_shapes,
        compiler_params=pltpu.CompilerParams(
            dimension_semantics=("parallel",)),
    )(x, eps, w1, w2, wh, wd1, wd2, wd3, biases_packed)

    mu = heads[:, :latent_dim]
    logvar = heads[:, latent_dim:2 * latent_dim]
    return out, mu, logvar


# --------------------------------------------------------------------------- #
# Parameter prep helpers
# --------------------------------------------------------------------------- #
def init_linear(key, fan_in, fan_out):
    """PyTorch nn.Linear default init (uniform +-1/sqrt(fan_in)).
    Weight returned pre-transposed as [fan_in, fan_out]; bias as [fan_out]."""
    kw, kb = jax.random.split(key)
    bound = 1.0 / jnp.sqrt(jnp.float32(fan_in))
    w = jax.random.uniform(kw, (fan_in, fan_out), jnp.float32, -bound, bound)
    b = jax.random.uniform(kb, (fan_out,), jnp.float32, -bound, bound)
    return w, b


def pack_biases(bias_list, width):
    """Pack 1-D biases into one [n_rows, width] f32 array (zero padded rows)."""
    rows = []
    for b in bias_list:
        b = b.reshape(-1)
        assert b.shape[0] <= width, (
            f"bias of width {b.shape[0]} does not fit packed width {width}")
        rows.append(jnp.pad(b, (0, width - b.shape[0])))
    return jnp.stack(rows, axis=0)


def prepare_params(enc1, enc2, mu_head, lv_head, dec1, dec2, dec3,
                   *, latent_dim, input_dim):
    """Fuse the mu/logvar heads, pad the fused head to a lane-dense width,
    cast weights to bf16 and pack all biases into one [6, width] f32 array."""
    (w1, b1), (w2, b2) = enc1, enc2
    (wmu, bmu), (wlv, blv) = mu_head, lv_head
    (wd1, bd1), (wd2, bd2), (wd3, bd3) = dec1, dec2, dec3

    head_pad = pl.cdiv(2 * latent_dim, 128) * 128        # lane-dense heads
    wh = jnp.concatenate([wmu, wlv], axis=1)             # [128, 2*latent]
    wh = jnp.pad(wh, ((0, 0), (0, head_pad - 2 * latent_dim)))
    bh = jnp.concatenate([bmu, blv], axis=0)             # [2*latent]

    weights = tuple(w.astype(jnp.bfloat16)
                    for w in (w1, w2, wh, wd1, wd2, wd3))
    bias_width = max(256, input_dim, head_pad)
    biases_packed = pack_biases((b1, b2, bh, bd1, bd2, bd3), bias_width)
    return weights, biases_packed


# --------------------------------------------------------------------------- #
# Pure-JAX reference (same bf16 math) for validation
# --------------------------------------------------------------------------- #
def vae_reference(x, eps, weights, biases_packed, latent_dim):
    w1, w2, wh, wd1, wd2, wd3 = weights

    def dense(a, w, row, relu):
        out_w = w.shape[1]
        y = jnp.dot(a.astype(jnp.bfloat16), w,
                    preferred_element_type=jnp.float32) + biases_packed[row, :out_w]
        if relu:
            return jnp.maximum(y, 0.0).astype(jnp.bfloat16)
        return y

    h = dense(x, w1, 0, True)
    h = dense(h, w2, 1, True)
    heads = dense(h, wh, 2, False)
    mu = heads[:, :latent_dim]
    logvar = heads[:, latent_dim:2 * latent_dim]
    z = (mu + eps * jnp.exp(0.5 * logvar)).astype(jnp.bfloat16)
    d = dense(z, wd1, 3, True)
    d = dense(d, wd2, 4, True)
    out = dense(d, wd3, 5, False)
    return out, mu, logvar


# --------------------------------------------------------------------------- #
# Demo / self-test
# --------------------------------------------------------------------------- #
if __name__ == "__main__":
    input_dim = 256
    latent_dim = 32
    batch = 256          # -> tb capped to 128, 2 parallel grid steps

    key = jax.random.PRNGKey(0)
    keys = jax.random.split(key, 9)

    # encoder
    enc1 = init_linear(keys[0], input_dim, 256)
    enc2 = init_linear(keys[1], 256, 128)
    # heads (fused + lane-padded in prepare_params)
    mu_head = init_linear(keys[2], 128, latent_dim)
    lv_head = init_linear(keys[3], 128, latent_dim)
    # decoder
    dec1 = init_linear(keys[4], latent_dim, 128)
    dec2 = init_linear(keys[5], 128, 256)
    dec3 = init_linear(keys[6], 256, input_dim)

    weights, biases_packed = prepare_params(
        enc1, enc2, mu_head, lv_head, dec1, dec2, dec3,
        latent_dim=latent_dim, input_dim=input_dim)

    # producer emits x directly in bf16 (no wrapper-side cast)
    x = jax.random.normal(keys[7], (batch, input_dim), jnp.bfloat16)
    # eps ~ N(0,1): same role as torch.randn_like, sampled outside the kernel;
    # re-key per call for fresh noise.
    eps = jax.random.normal(keys[8], (batch, latent_dim), jnp.float32)

    out, mu, logvar = vae_forward(x, eps, weights, biases_packed)
    jax.block_until_ready((out, mu, logvar))

    assert out.shape == (batch, input_dim)
    assert mu.shape == (batch, latent_dim)
    assert logvar.shape == (batch, latent_dim)

    # correctness check against a pure-JAX reference with identical bf16 math
    ref_out, ref_mu, ref_lv = vae_reference(x, eps, weights, biases_packed,
                                            latent_dim)
    assert jnp.allclose(out.astype(jnp.float32), ref_out, atol=3e-2, rtol=3e-2)
    assert jnp.allclose(mu, ref_mu, atol=2e-2, rtol=2e-2)
    assert jnp.allclose(logvar, ref_lv, atol=2e-2, rtol=2e-2)

    print("KERNEL_OK")
</pallas_src>

<mosaic_0001>
module attributes {stable_mosaic.version = 11 : i64} {
  func.func @vae_kernel(%arg0: i32, %arg1: memref<128x256xbf16, #tpu.memory_space<vmem>>, %arg2: memref<128x32xf32, #tpu.memory_space<vmem>>, %arg3: memref<256x256xbf16, #tpu.memory_space<vmem>>, %arg4: memref<256x128xbf16, #tpu.memory_space<vmem>>, %arg5: memref<128x128xbf16, #tpu.memory_space<vmem>>, %arg6: memref<32x128xbf16, #tpu.memory_space<vmem>>, %arg7: memref<128x256xbf16, #tpu.memory_space<vmem>>, %arg8: memref<256x256xbf16, #tpu.memory_space<vmem>>, %arg9: memref<6x256xf32, #tpu.memory_space<vmem>>, %arg10: memref<128x256xbf16, #tpu.memory_space<vmem>>, %arg11: memref<128x128xf32, #tpu.memory_space<vmem>>) attributes {dimension_semantics = [#tpu.dimension_semantics<parallel>], iteration_bounds = array<i64: 2>, scalar_prefetch = 0 : i64, scratch_operands = 0 : i64, tpu.core_type = #tpu.core_type<tc>, window_params = [{transform_indices = @transform_0, window_bounds = array<i64: 128, 256>}, {transform_indices = @transform_1, window_bounds = array<i64: 128, 32>}, {pipeline_mode = #tpu.pipeline_mode<synchronous>, transform_indices = @transform_2, window_bounds = array<i64: 256, 256>}, {pipeline_mode = #tpu.pipeline_mode<synchronous>, transform_indices = @transform_3, window_bounds = array<i64: 256, 128>}, {pipeline_mode = #tpu.pipeline_mode<synchronous>, transform_indices = @transform_4, window_bounds = array<i64: 128, 128>}, {pipeline_mode = #tpu.pipeline_mode<synchronous>, transform_indices = @transform_5, window_bounds = array<i64: 32, 128>}, {pipeline_mode = #tpu.pipeline_mode<synchronous>, transform_indices = @transform_6, window_bounds = array<i64: 128, 256>}, {pipeline_mode = #tpu.pipeline_mode<synchronous>, transform_indices = @transform_7, window_bounds = array<i64: 256, 256>}, {pipeline_mode = #tpu.pipeline_mode<synchronous>, transform_indices = @transform_8, window_bounds = array<i64: 6, 256>}, {transform_indices = @transform_9, window_bounds = array<i64: 128, 256>}, {transform_indices = @transform_10, window_bounds = array<i64: 128, 128>}]} {
    %c0 = arith.constant 0 : index
    %c0_0 = arith.constant 0 : index
    %0 = vector.load %arg1[%c0, %c0_0] : memref<128x256xbf16, #tpu.memory_space<vmem>>, vector<128x256xbf16>
    %c0_1 = arith.constant 0 : index
    %c0_2 = arith.constant 0 : index
    %1 = vector.load %arg3[%c0_1, %c0_2] : memref<256x256xbf16, #tpu.memory_space<vmem>>, vector<256x256xbf16>
    %cst = arith.constant dense<0.000000e+00> : vector<128x256xf32>
    %2 = tpu.matmul %0, %1, %cst {dimension_numbers = #tpu.dot_dimension_numbers<[1], [0], [0], [1], [0, 0, 1, 1], [], []>} : vector<128x256xbf16>, vector<256x256xbf16>, vector<128x256xf32> -> vector<128x256xf32>
    %c0_3 = arith.constant 0 : index
    %c0_4 = arith.constant 0 : index
    %3 = vector.load %arg9[%c0_3, %c0_4] : memref<6x256xf32, #tpu.memory_space<vmem>>, vector<1x256xf32>
    %4 = vector.broadcast %3 : vector<1x256xf32> to vector<128x256xf32>
    %5 = arith.addf %2, %4 : vector<128x256xf32>
    %cst_5 = arith.constant 0.000000e+00 : f32
    %6 = vector.broadcast %cst_5 : f32 to vector<128x256xf32>
    %7 = arith.maximumf %5, %6 : vector<128x256xf32>
    %8 = arith.truncf %7 : vector<128x256xf32> to vector<128x256xbf16>
    %c0_6 = arith.constant 0 : index
    %c0_7 = arith.constant 0 : index
    %9 = vector.load %arg4[%c0_6, %c0_7] : memref<256x128xbf16, #tpu.memory_space<vmem>>, vector<256x128xbf16>
    %cst_8 = arith.constant dense<0.000000e+00> : vector<128x128xf32>
    %10 = tpu.matmul %8, %9, %cst_8 {dimension_numbers = #tpu.dot_dimension_numbers<[1], [0], [0], [1], [0, 0, 1, 1], [], []>} : vector<128x256xbf16>, vector<256x128xbf16>, vector<128x128xf32> -> vector<128x128xf32>
    %c1 = arith.constant 1 : index
    %c0_9 = arith.constant 0 : index
    %11 = vector.load %arg9[%c1, %c0_9] : memref<6x256xf32, #tpu.memory_space<vmem>>, vector<1x128xf32>
    %12 = vector.broadcast %11 : vector<1x128xf32> to vector<128x128xf32>
    %13 = arith.addf %10, %12 : vector<128x128xf32>
    %cst_10 = arith.constant 0.000000e+00 : f32
    %14 = vector.broadcast %cst_10 : f32 to vector<128x128xf32>
    %15 = arith.maximumf %13, %14 : vector<128x128xf32>
    %16 = arith.truncf %15 : vector<128x128xf32> to vector<128x128xbf16>
    %c0_11 = arith.constant 0 : index
    %c0_12 = arith.constant 0 : index
    %17 = vector.load %arg5[%c0_11, %c0_12] : memref<128x128xbf16, #tpu.memory_space<vmem>>, vector<128x128xbf16>
    %cst_13 = arith.constant dense<0.000000e+00> : vector<128x128xf32>
    %18 = tpu.matmul %16, %17, %cst_13 {dimension_numbers = #tpu.dot_dimension_numbers<[1], [0], [0], [1], [0, 0, 1, 1], [], []>} : vector<128x128xbf16>, vector<128x128xbf16>, vector<128x128xf32> -> vector<128x128xf32>
    %c2 = arith.constant 2 : index
    %c0_14 = arith.constant 0 : index
    %19 = vector.load %arg9[%c2, %c0_14] : memref<6x256xf32, #tpu.memory_space<vmem>>, vector<1x128xf32>
    %20 = vector.broadcast %19 : vector<1x128xf32> to vector<128x128xf32>
    %21 = arith.addf %18, %20 : vector<128x128xf32>
    %22 = vector.extract_strided_slice %21 {offsets = [0, 0], sizes = [128, 32], strides = [1, 1]} : vector<128x128xf32> to vector<128x32xf32>
    %23 = vector.extract_strided_slice %21 {offsets = [0, 32], sizes = [128, 32], strides = [1, 1]} : vector<128x128xf32> to vector<128x32xf32>
    %c0_15 = arith.constant 0 : index
    %c0_16 = arith.constant 0 : index
    %24 = vector.load %arg2[%c0_15, %c0_16] : memref<128x32xf32, #tpu.memory_space<vmem>>, vector<128x32xf32>
    %cst_17 = arith.constant 5.000000e-01 : f32
    %25 = vector.broadcast %cst_17 : f32 to vector<128x32xf32>
    %26 = arith.mulf %25, %23 : vector<128x32xf32>
    %27 = math.exp %26 : vector<128x32xf32>
    %28 = arith.mulf %24, %27 : vector<128x32xf32>
    %29 = arith.addf %22, %28 : vector<128x32xf32>
    %30 = arith.truncf %29 : vector<128x32xf32> to vector<128x32xbf16>
    %c0_18 = arith.constant 0 : index
    %c0_19 = arith.constant 0 : index
    %31 = vector.load %arg6[%c0_18, %c0_19] : memref<32x128xbf16, #tpu.memory_space<vmem>>, vector<32x128xbf16>
    %cst_20 = arith.constant dense<0.000000e+00> : vector<128x128xf32>
    %32 = tpu.matmul %30, %31, %cst_20 {dimension_numbers = #tpu.dot_dimension_numbers<[1], [0], [0], [1], [0, 0, 1, 1], [], []>} : vector<128x32xbf16>, vector<32x128xbf16>, vector<128x128xf32> -> vector<128x128xf32>
    %c3 = arith.constant 3 : index
    %c0_21 = arith.constant 0 : index
    %33 = vector.load %arg9[%c3, %c0_21] : memref<6x256xf32, #tpu.memory_space<vmem>>, vector<1x128xf32>
    %34 = vector.broadcast %33 : vector<1x128xf32> to vector<128x128xf32>
    %35 = arith.addf %32, %34 : vector<128x128xf32>
    %cst_22 = arith.constant 0.000000e+00 : f32
    %36 = vector.broadcast %cst_22 : f32 to vector<128x128xf32>
    %37 = arith.maximumf %35, %36 : vector<128x128xf32>
    %38 = arith.truncf %37 : vector<128x128xf32> to vector<128x128xbf16>
    %c0_23 = arith.constant 0 : index
    %c0_24 = arith.constant 0 : index
    %39 = vector.load %arg7[%c0_23, %c0_24] : memref<128x256xbf16, #tpu.memory_space<vmem>>, vector<128x256xbf16>
    %cst_25 = arith.constant dense<0.000000e+00> : vector<128x256xf32>
    %40 = tpu.matmul %38, %39, %cst_25 {dimension_numbers = #tpu.dot_dimension_numbers<[1], [0], [0], [1], [0, 0, 1, 1], [], []>} : vector<128x128xbf16>, vector<128x256xbf16>, vector<128x256xf32> -> vector<128x256xf32>
    %c4 = arith.constant 4 : index
    %c0_26 = arith.constant 0 : index
    %41 = vector.load %arg9[%c4, %c0_26] : memref<6x256xf32, #tpu.memory_space<vmem>>, vector<1x256xf32>
    %42 = vector.broadcast %41 : vector<1x256xf32> to vector<128x256xf32>
    %43 = arith.addf %40, %42 : vector<128x256xf32>
    %cst_27 = arith.constant 0.000000e+00 : f32
    %44 = vector.broadcast %cst_27 : f32 to vector<128x256xf32>
    %45 = arith.maximumf %43, %44 : vector<128x256xf32>
    %46 = arith.truncf %45 : vector<128x256xf32> to vector<128x256xbf16>
    %c0_28 = arith.constant 0 : index
    %c0_29 = arith.constant 0 : index
    %47 = vector.load %arg8[%c0_28, %c0_29] : memref<256x256xbf16, #tpu.memory_space<vmem>>, vector<256x256xbf16>
    %cst_30 = arith.constant dense<0.000000e+00> : vector<128x256xf32>
    %48 = tpu.matmul %46, %47, %cst_30 {dimension_numbers = #tpu.dot_dimension_numbers<[1], [0], [0], [1], [0, 0, 1, 1], [], []>} : vector<128x256xbf16>, vector<256x256xbf16>, vector<128x256xf32> -> vector<128x256xf32>
    %c5 = arith.constant 5 : index
    %c0_31 = arith.constant 0 : index
    %49 = vector.load %arg9[%c5, %c0_31] : memref<6x256xf32, #tpu.memory_space<vmem>>, vector<1x256xf32>
    %50 = vector.broadcast %49 : vector<1x256xf32> to vector<128x256xf32>
    %51 = arith.addf %48, %50 : vector<128x256xf32>
    %52 = arith.truncf %51 : vector<128x256xf32> to vector<128x256xbf16>
    %c0_32 = arith.constant 0 : index
    %c0_33 = arith.constant 0 : index
    %53 = vector.load %arg10[%c0_32, %c0_33] : memref<128x256xbf16, #tpu.memory_space<vmem>>, vector<128x256xbf16>
    tpu.vector_store %arg10[%c0_32, %c0_33], %52 {strides = array<i32>} : memref<128x256xbf16, #tpu.memory_space<vmem>>, vector<128x256xbf16>,
    %c0_34 = arith.constant 0 : index
    %c0_35 = arith.constant 0 : index
    %54 = vector.load %arg11[%c0_34, %c0_35] : memref<128x128xf32, #tpu.memory_space<vmem>>, vector<128x128xf32>
    tpu.vector_store %arg11[%c0_34, %c0_35], %21 {strides = array<i32>} : memref<128x128xf32, #tpu.memory_space<vmem>>, vector<128x128xf32>,
    return
  }
  func.func @transform_0(%arg0: i32) -> (i32, i32) {
    %c0_i32 = arith.constant 0 : i32
    %c0_i32_0 = arith.constant 0 : i32
    return %arg0, %c0_i32 : i32, i32
  }
  func.func @transform_1(%arg0: i32) -> (i32, i32) {
    %c0_i32 = arith.constant 0 : i32
    %c0_i32_0 = arith.constant 0 : i32
    return %arg0, %c0_i32 : i32, i32
  }
  func.func @transform_2(%arg0: i32) -> (i32, i32) {
    %c0_i32 = arith.constant 0 : i32
    %c0_i32_0 = arith.constant 0 : i32
    %c0_i32_1 = arith.constant 0 : i32
    return %c0_i32, %c0_i32_0 : i32, i32
  }
  func.func @transform_3(%arg0: i32) -> (i32, i32) {
    %c0_i32 = arith.constant 0 : i32
    %c0_i32_0 = arith.constant 0 : i32
    %c0_i32_1 = arith.constant 0 : i32
    return %c0_i32, %c0_i32_0 : i32, i32
  }
  func.func @transform_4(%arg0: i32) -> (i32, i32) {
    %c0_i32 = arith.constant 0 : i32
    %c0_i32_0 = arith.constant 0 : i32
    %c0_i32_1 = arith.constant 0 : i32
    return %c0_i32, %c0_i32_0 : i32, i32
  }
  func.func @transform_5(%arg0: i32) -> (i32, i32) {
    %c0_i32 = arith.constant 0 : i32
    %c0_i32_0 = arith.constant 0 : i32
    %c0_i32_1 = arith.constant 0 : i32
    return %c0_i32, %c0_i32_0 : i32, i32
  }
  func.func @transform_6(%arg0: i32) -> (i32, i32) {
    %c0_i32 = arith.constant 0 : i32
    %c0_i32_0 = arith.constant 0 : i32
    %c0_i32_1 = arith.constant 0 : i32
    return %c0_i32, %c0_i32_0 : i32, i32
  }
  func.func @transform_7(%arg0: i32) -> (i32, i32) {
    %c0_i32 = arith.constant 0 : i32
    %c0_i32_0 = arith.constant 0 : i32
    %c0_i32_1 = arith.constant 0 : i32
    return %c0_i32, %c0_i32_0 : i32, i32
  }
  func.func @transform_8(%arg0: i32) -> (i32, i32) {
    %c0_i32 = arith.constant 0 : i32
    %c0_i32_0 = arith.constant 0 : i32
    %c0_i32_1 = arith.constant 0 : i32
    return %c0_i32, %c0_i32_0 : i32, i32
  }
  func.func @transform_9(%arg0: i32) -> (i32, i32) {
    %c0_i32 = arith.constant 0 : i32
    %c0_i32_0 = arith.constant 0 : i32
    return %arg0, %c0_i32 : i32, i32
  }
  func.func @transform_10(%arg0: i32) -> (i32, i32) {
    %c0_i32 = arith.constant 0 : i32
    %c0_i32_0 = arith.constant 0 : i32
    return %arg0, %c0_i32 : i32, i32
  }
}

</mosaic_0001>

<bundles_post_ra>
// kernel: tpu_custom_call.1
= control target key start
LH: loop header
LB: loop body
LE: loop exit
PB: predicated region body
PF: predicated region fallthrough
CT: control target
= control target key end

     0   :  { %16 = vsyncpa [#allocation3], 0  ;;  %s4229_s0 = inlined_call_operand.vmem [shape: bf16[256,256], index: 0, kind: input, shape index: {}]   ;;  %s4230_s1 = inlined_call_operand.vmem [shape: f32[256,32], index: 1, kind: input, shape index: {}]   ;;  %s4231_s2 = inlined_call_operand.hbm [shape: bf16[256,256], index: 2, kind: input, shape index: {}]   ;;  %s4232_s3 = inlined_call_operand.hbm [shape: bf16[256,128], index: 3, kind: input, shape index: {}]   ;;  %s4233_s4 = inlined_call_operand.vmem [shape: bf16[128,128], index: 4, kind: input, shape index: {}]   ;;  %s4234_s5 = inlined_call_operand.hbm [shape: bf16[32,128], index: 5, kind: input, shape index: {}]   ;;  %s4235_s6 = inlined_call_operand.hbm [shape: bf16[128,256], index: 6, kind: input, shape index: {}]   ;;  %s4236_s7 = inlined_call_operand.hbm [shape: bf16[256,256], index: 7, kind: input, shape index: {}]   ;;  %s4237_s8 = inlined_call_operand.hbm [shape: f32[6,256], index: 8, kind: input, shape index: {}]   ;;  %s4238_s9 = inlined_call_operand.hbm [shape: bf16[256,256], index: 9, kind: output, shape index: {0}]   ;;  %s4239_s10 = inlined_call_operand.hbm [shape: f32[256,128], index: 10, kind: output, shape index: {1}]  }
   0x1   :  { %17 = vsyncpa [#allocation6], 0 }
   0x2   :  { %18 = vsyncpa [#allocation9], 0 }
   0x3   :  { %19 = vsyncpa [#allocation12], 0 }
   0x4   :  { %20 = vsyncpa [#allocation4], 0 }
   0x5   :  { %22 = vsyncpa [#allocation4 + $0x1], 0 }
   0x6   :  { %23 = vsyncpa [#allocation15], 0 }
   0x7   :  { %25 = vsyncpa [#allocation15 + $0x1], 0  ;;  %s3597_s13 = smov 0   ;;  %s3599_s14 = smov 0  }
   0x8   :  { %s3601_s15 = smov 0   ;;  %s3603_s16 = smov 0  }
   0x9 LB: > { %4247 = sst [smem:[#allocation22_spill]] %s3520_s15  ;;  %s3618_s17 = sadd.s32 4294967295, %s3524_s16   ;;  %s3524_s16 = sphi %s3603_s16, %s4266_s16   ;;  %s3520_s15 = sphi %s3601_s15, %s4268_s15   ;;  %s3516_s14 = sphi %s3599_s14, %s4270_s14   ;;  %s3512_s13 = sphi %s3597_s13, %s4269_s13  }
   0xa   : > { %s2607_s18 = sadd.s32 4294967294, %s3524_s16   ;;  %s3622_s19 = sadd.s32 1, %s3524_s16  }
   0xb   : > { %4248 = sst [smem:[#allocation23_spill]] %s3622_s19  ;;  %s237_s20 = sadd.s32 1, %s3520_s15 }
   0xc   : > { %s234_s21 = ssub.s32 %s3524_s16, %s3622_s19  ;;  %p247_p0 = scmp.ne.s32.totalorder %s3520_s15, %s3516_s14 }
   0xd   : > { %p235_p1 = scmp.eq.s32.totalorder %s234_s21, 0  ;;  %p248_p2 = scmp.eq.s32.totalorder %s3618_s17, 1 }
   0xe   : > { %p253_p3 = scmp.ne.s32.totalorder %s3516_s14, %s3512_s13  ;;  %p254_p4 = scmp.eq.s32.totalorder %s2607_s18, 1 }
   0xf   : > { %s3633_s22 = scalar_select %p235_p1, %s3520_s15, %s237_s20  }
  0x10   : > { %p3635_p5 = por %p248_p2, %p247_p0  ;;  %p3639_p6 = por %p254_p4, %p253_p3 }
  0x11   : > { %4249 = sst [smem:[#allocation24_spill]] %s3633_s22  ;;  %p2608_p7 = scmp.ge.s32.totalorder %s3524_s16, 1 }
  0x12   : > { %p287_p8 = scmp.lt.s32.totalorder %s3524_s16, 3  ;;  %p4245_p9 = scmp.eq.s32.totalorder %s3618_s17, 0 }
  0x13   : > { %s3526_s26 = smov [#allocation5]   ;;  %s3527_s29 = smov [#allocation8]  }
  0x14   : > { %p3646_p10 = pnand %p2608_p7, %p287_p8  ;;  %s312_s27 = sshll.u32 %s3526_s26, 4  ;;  %s313_s27 = int_to_ptr.vmem [resolvable:$true] %s312_s27 }
  0x15   : > { %s341_s30 = sshll.u32 %s3527_s29, 4  ;;  %s3273_s12 = scalar_lea.vmem %s313_s27, 2048  ;;  %s342_s30 = int_to_ptr.vmem [resolvable:$true] %s341_s30 }
  0x16   : > { %p2975_p11 = pneg %p3646_p10  ;;  %p3274_p0 = scmp.ne.s32.totalorder %s313_s27, %s3273_s12 }
  0x17   : > { %p3281_p3 = scmp.lt.s32.totalorder %s313_s27, %s313_s27  ;;  %p3282_p4 = scmp.lt.s32.totalorder %s3273_s12, %s3273_s12 }
  0x18   : > { %p3654_p12 = pnand %p4245_p9, %p2975_p11 }
  0x19   : > { %p3283_p7 = por %p3282_p4, %p3281_p3 }
  0x1a   : > { %p3660_p13 = pneg %p3654_p12 }
  0x1c   : > { %p3276_p1 = pnand %p3274_p0, %p3660_p13 }
  0x1e   : > { %p3277_p2 = pneg %p3276_p1 }
  0x20   : > { %p3284_p8 = pnand %p3283_p7, %p3277_p2 }
  0x22   : > { %3287 = shalt.err (!%p3284_p8)
}
  0x23   : > { %s4243_s18 = smov 64   ;;  %s4244_s20 = smov 4  }
  0x24   : > { %2981 = dma.hbm_to_vmem [thread:$0]  (!%p3654_p12), %s4232_s3, 2048, %s313_s27, [#allocation6], %s4243_s18, %s4243_s18, %s4244_s20  }
  0x25   : > { %s3530_s29 = smov [#allocation2]   ;;  %s3299_s15 = scalar_lea.vmem %s342_s30, 2048 }
  0x26   : > { %s299_s22 = sshll.u32 %s3530_s29, 4  ;;  %p3300_p11 = scmp.ne.s32.totalorder %s342_s30, %s3299_s15  ;;  %s300_s22 = int_to_ptr.vmem [resolvable:$true] %s299_s22 }
  0x27   : > { %p3307_p2 = scmp.lt.s32.totalorder %s342_s30, %s342_s30  ;;  %p3308_p3 = scmp.lt.s32.totalorder %s3299_s15, %s3299_s15 }
  0x28   : > { %p3302_p0 = pnand %p3300_p11, %p3660_p13 }
  0x29   : > { %p3309_p4 = por %p3308_p3, %p3307_p2 }
  0x2a   : > { %p3303_p1 = pneg %p3302_p0 }
  0x2c   : > { %p3310_p7 = pnand %p3309_p4, %p3303_p1 }
  0x2e   : > { %3313 = shalt.err (!%p3310_p7)
}
  0x2f   : > { %s3531_s12 = smov 128   ;;  %s3532_s19 = smov 8  }
  0x30   : > { %2987 = dma.hbm_to_vmem [thread:$0]  (!%p3654_p12), %s4235_s6, 2048, %s342_s30, [#allocation9], %s3531_s12, %s3531_s12, %s3532_s19  }
  0x31   : > { %s3325_s26 = scalar_lea.vmem %s300_s22, 4096  ;;  %p3333_p1 = scmp.lt.s32.totalorder %s300_s22, %s300_s22 }
  0x32   : > { %p3326_p8 = scmp.ne.s32.totalorder %s300_s22, %s3325_s26  ;;  %p3334_p2 = scmp.lt.s32.totalorder %s3325_s26, %s3325_s26 }
  0x34   : > { %p3328_p11 = pnand %p3326_p8, %p3660_p13  ;;  %p3335_p3 = por %p3334_p2, %p3333_p1 }
  0x36   : > { %p3329_p0 = pneg %p3328_p11 }
  0x38   : > { %p3336_p4 = pnand %p3335_p3, %p3329_p0 }
  0x3a   : > { %3339 = shalt.err (!%p3336_p4)
}
  0x3b   : > { %2978 = dma.hbm_to_vmem [thread:$0]  (!%p3654_p12), %s4231_s2, 4096, %s300_s22, [#allocation3], %s3531_s12, %s3531_s12, %s3532_s19  }
  0x3c   : > { %s3533_s30 = smov [#allocation7]   ;;  %s3534_s21 = smov [#allocation10]  }
  0x3d   : > { %s328_s27 = sshll.u32 %s3533_s30, 4  ;;  %s354_s18 = sshll.u32 %s3534_s21, 4  ;;  %s329_s27 = int_to_ptr.vmem [resolvable:$true] %s328_s27  ;;  %s355_s18 = int_to_ptr.vmem [resolvable:$true] %s354_s18 }
  0x3e   : > { %s3351_s20 = scalar_lea.vmem %s329_s27, 256  ;;  %p3359_p0 = scmp.lt.s32.totalorder %s329_s27, %s329_s27 }
  0x3f   : > { %p3352_p7 = scmp.ne.s32.totalorder %s329_s27, %s3351_s20  ;;  %p3360_p1 = scmp.lt.s32.totalorder %s3351_s20, %s3351_s20 }
  0x41   : > { %p3354_p8 = pnand %p3352_p7, %p3660_p13  ;;  %p3361_p2 = por %p3360_p1, %p3359_p0 }
  0x43   : > { %p3355_p11 = pneg %p3354_p8 }
  0x45   : > { %p3362_p3 = pnand %p3361_p2, %p3355_p11 }
  0x47   : > { %3365 = shalt.err (!%p3362_p3)
}
  0x48   : > { %s4255_s26 = smov 4   ;;  %s4256_s15 = smov 64  }
  0x49   : > { %2984 = dma.hbm_to_vmem [thread:$0]  (!%p3654_p12), %s4234_s5, 256, %s329_s27, [#allocation6], %s4256_s15, %s4256_s15, %s4255_s26  }
  0x4a   : > { %s3377_s30 = scalar_lea.vmem %s355_s18, 4096  ;;  %p3385_p9 = scmp.lt.s32.totalorder %s355_s18, %s355_s18 }
  0x4b   : > { %p3378_p4 = scmp.ne.s32.totalorder %s355_s18, %s3377_s30  ;;  %p3386_p0 = scmp.lt.s32.totalorder %s3377_s30, %s3377_s30 }
  0x4d   : > { %p3380_p7 = pnand %p3378_p4, %p3660_p13  ;;  %p3387_p11 = por %p3386_p0, %p3385_p9 }
  0x4f   : > { %p3381_p8 = pneg %p3380_p7 }
  0x51   : > { %p3388_p1 = pnand %p3387_p11, %p3381_p8 }
  0x53   : > { %3391 = shalt.err (!%p3388_p1)
}
  0x54   : > { %2990 = dma.hbm_to_vmem [thread:$0]  (!%p3654_p12), %s4236_s7, 4096, %s355_s18, [#allocation9], %s3531_s12, %s3531_s12, %s3532_s19  }
  0x55   : > { %s3535_s27 = smov [#allocation11]  }
  0x56   : > { %s368_s26 = sshll.u32 %s3535_s27, 4  ;;  %s369_s26 = int_to_ptr.vmem [resolvable:$true] %s368_s26 }
  0x57   : > { %s3403_s15 = scalar_lea.vmem %s369_s26, 256  ;;  %p3411_p4 = scmp.lt.s32.totalorder %s369_s26, %s369_s26 }
  0x58   : > { %p3404_p2 = scmp.ne.s32.totalorder %s369_s26, %s3403_s15  ;;  %p3412_p7 = scmp.lt.s32.totalorder %s3403_s15, %s3403_s15 }
  0x5a   : > { %p3406_p3 = pnand %p3404_p2, %p3660_p13  ;;  %p3413_p8 = por %p3412_p7, %p3411_p4 }
  0x5c   : > { %p3407_p9 = pneg %p3406_p3 }
  0x5e   : > { %p3414_p0 = pnand %p3413_p8, %p3407_p9 }
  0x60   : > { %3417 = shalt.err (!%p3414_p0)
}
  0x61   : > { %2993 = dma.hbm_to_vmem [thread:$0]  (!%p3654_p12), %s4237_s8, 256, %s369_s26, [#allocation12]  }
  0x62   : > { %400 = sbr.rel (%p3646_p10) target bundleno = 1626 (0x65a), region = 56  ;;  %p4257_p11 = scmp.eq.s32.totalorder (!%p3646_p10), %s3618_s17, 0 }
  0x67   : > { %3487 = dma.done.wait (%p4257_p11), [#allocation3], 4096   ;;  %p4258_p13 = pmov %p4257_p11 }
  0x68   : > { %p4259_p1 = pmov %p4257_p11 }
  0x69   : > { %3489 = vsyncadd (%p4258_p13), [#allocation3], 4294963200 }
  0x6a   : > { %3491 = dma.done.wait (%p4259_p1), [#allocation6], 2304   ;;  %p4260_p2 = pmov %p4259_p1 }
  0x6b   : > { %p4261_p3 = pmov %p4259_p1 }
  0x6c   : > { %3493 = vsyncadd (%p4260_p2), [#allocation6], 4294964992 }
  0x6d   : > { %3495 = dma.done.wait (%p4261_p3), [#allocation9], 6144   ;;  %p4262_p12 = pmov %p4259_p1 }
  0x6e   : > { %p4263_p10 = pmov %p4259_p1 }
  0x6f   : > { %3497 = vsyncadd (%p4262_p12), [#allocation9], 4294961152 }
  0x70   : > { %3499 = dma.done.wait (%p4263_p10), [#allocation12], 256   ;;  %p4264_p9 = pmov %p4259_p1 }
  0x71   : > { %v3060_v0 = vld [vmem:[#allocation2 + $0x74] ss:$8 sps:$4 sm:$0xff]   ;;  %v3062_v1 = vld [vmem:[#allocation2 + $0x70] ss:$8 sps:$4 sm:$0xff]   ;;  %v3063_v2 = vld [vmem:[#allocation2 + $0x64] ss:$8 sps:$4 sm:$0xff]  }
  0x72   : > { %3501 = vsyncadd (%p4264_p9), [#allocation12], 4294967040  ;;  %785 = vmatprep.subr.bf16.mxu0 %v3060_v0  ;;  %v3065_v3 = vld [vmem:[#allocation2 + $0x60] ss:$8 sps:$4 sm:$0xff]   ;;  %v3066_v4 = vld [vmem:[#allocation2 + $0x54] ss:$8 sps:$4 sm:$0xff]  }
  0x73   : > { %786 = vmatpush1.bf16.msra.mxu0 %v3062_v1  ;;  %s2625_s19 = sshll.u32 %s3618_s17, 4  ;;  %v3068_v5 = vld [vmem:[#allocation2 + $0x50] ss:$8 sps:$4 sm:$0xff]   ;;  %v3069_v6 = vld [vmem:[#allocation2 + $0x44] ss:$8 sps:$4 sm:$0xff]   ;;  %v535_v1 = vlaneseq  ;;  %s3851_s27 = sand.u32 1, %s3516_s14  }
  0x74   : > { %787 = vmatprep.subr.bf16.mxu0 %v3063_v2  ;;  %p470_p4 = scmp.lt.s32.totalorder %s2625_s19, 31  ;;  %v3071_v7 = vld [vmem:[#allocation2 + $0x40] ss:$8 sps:$4 sm:$0xff]   ;;  %v3072_v8 = vld [vmem:[#allocation2 + $0x34] ss:$8 sps:$4 sm:$0xff]   ;;  %s2623_s26 = sshll.u32 %s3851_s27, 7 }
  0x75   : > { %v3074_v9 = vld [vmem:[#allocation2 + $0x30] ss:$8 sps:$4 sm:$0xff]   ;;  %v3075_v10 = vld [vmem:[#allocation2 + $0x24] ss:$8 sps:$4 sm:$0xff]   ;;  %v3077_v11 = vld [vmem:[#allocation2 + $0x20] ss:$8 sps:$4 sm:$0xff]  }
  0x76   : > { %s4272_s19 = smov (!%p470_p4, %s2625_s19), 31  ;;  %v3078_v12 = vld [vmem:[#allocation2 + $0x14] ss:$8 sps:$4 sm:$0xff]   ;;  %v3080_v14 = vld [vmem:[#allocation2 + $0x10] ss:$8 sps:$4 sm:$0xff]   ;;  %v3136_v26 = vld [vmem:[#allocation5 + $0x68] sm:$0xff]  }
  0x77   : > { %788 = vmatpush1.bf16.msra.mxu0 %v3065_v3  ;;  %s2785_s25 = sshll.u32 %s4272_s19, 3  ;;  %v3081_v15 = vld [vmem:[#allocation2 + $0x4] ss:$8 sps:$4 sm:$0xff]   ;;  %v3083_v16 = vld [vmem:[#allocation2] ss:$8 sps:$4 sm:$0xff]   ;;  %v3132_v20 = vld [vmem:[#allocation5 + $0x78] sm:$0xff]  }
  0x78   : > { %789 = vmatprep.subr.bf16.mxu0 %v3066_v4  ;;  %s3748_s18 = scalar_lea.vmem %s4229_s0, %s2785_s25  ;;  %v3084_v17 = vld [vmem:[#allocation2 + $0xf4] ss:$8 sps:$4 sm:$0xff]   ;;  %v3086_v18 = vld [vmem:[#allocation2 + $0xf0] ss:$8 sps:$4 sm:$0xff]   ;;  %v3087_v19 = vld [vmem:[#allocation2 + $0xe4] ss:$8 sps:$4 sm:$0xff]   ;;  %2805 = vmatprep.subr.bf16.mxu1 %v3132_v20  ;;  %s3977_s11 = scalar_lea.vmem %s4230_s1, %s2785_s25 }
  0x79   : > { %v3110_v13 = vld [vmem:[%s3748_s18 + $0x4] ss:$8 sps:$4 sm:$0xff]   ;;  %v3089_v21 = vld [vmem:[#allocation2 + $0xe0] ss:$8 sps:$4 sm:$0xff]   ;;  %v3133_v22 = vld [vmem:[#allocation5 + $0x38] sm:$0xff]   ;;  %v536_v2 = vshrl.u32 %v535_v1, 7 }
  0x7a   : > { %817 = vmatprep.mubr.bf16.mxu0 %v3110_v13  ;;  %v3090_v23 = vld [vmem:[#allocation2 + $0xd4] ss:$8 sps:$4 sm:$0xff]   ;;  %2806 = vmatpush3.bf16.msra.mxu1 %v3133_v22  ;;  %v3092_v27 = vld [vmem:[#allocation2 + $0xd0] ss:$8 sps:$4 sm:$0xff]   ;;  %v3093_v28 = vld [vmem:[#allocation2 + $0xc4] ss:$8 sps:$4 sm:$0xff]  }
  0x7b   : > { %790 = vmatpush1.bf16.msra.mxu0 %v3068_v5  ;;  %v3134_v24 = vld [vmem:[#allocation5 + $0x70] sm:$0xff]   ;;  %v3137_v29 = vld [vmem:[#allocation5 + $0x28] sm:$0xff]   ;;  %v3138_v30 = vld [vmem:[#allocation5 + $0x60] sm:$0xff]   ;;  %v3769_v3 = vsub.s32 1, %v536_v2  ;;  %v3771_v4 = vsub.s32 0, %v536_v2  ;;  %s3862_s15 = scalar_lea.vmem [#allocation14], %s2623_s26 }
  0x7c   : > { %791 = vmatprep.subr.bf16.mxu0 %v3069_v6  ;;  %v3135_v25 = vld [vmem:[#allocation5 + $0x30] sm:$0xff]   ;;  %2807 = vmatprep.subr.bf16.mxu1 %v3134_v24  ;;  %v3095_v31 = vld [vmem:[#allocation2 + $0xc0] ss:$8 sps:$4 sm:$0xff]   ;;  %v3140_v34 = vld [vmem:[#allocation5 + $0x58] sm:$0xff]   ;;  %s3536_s22 = smov 96   ;;  %vm1543_vm0 = vcmask 261120  }
  0x7d   : > { %v3139_v32 = vld [vmem:[#allocation5 + $0x20] sm:$0xff]   ;;  %v3096_v33 = vld [vmem:[#allocation2 + $0xb4] ss:$8 sps:$4 sm:$0xff]   ;;  %v3098_v35 = vld [vmem:[#allocation2 + $0xb0] ss:$8 sps:$4 sm:$0xff]   ;;  %s4246_s19 = sshll.u32 %s3618_s17, 11 }
  0x7e   : > { %2808 = vmatpush3.bf16.msra.mxu1 %v3135_v25  ;;  %v3141_v36 = vld [vmem:[#allocation5 + $0x18] sm:$0xff]   ;;  %v3099_v37 = vld [vmem:[#allocation2 + $0xa4] ss:$8 sps:$4 sm:$0xff]   ;;  %v3101_v38 = vld [vmem:[#allocation2 + $0xa0] ss:$8 sps:$4 sm:$0xff]   ;;  %s4089_s12 = scalar_lea.hbm %s4239_s10, %s4246_s19  ;;  %s2441_s30 = sshll.u32 %s3862_s15, 4  ;;  %s4092_s30 = int_to_ptr.vmem [resolvable:$true] %s2441_s30 }
  0x7f   : > { %792 = vmatpush1.bf16.msra.mxu0 %v3071_v7  ;;  %2809 = vmatprep.subr.bf16.mxu1 %v3136_v26  ;;  %v3102_v39 = vld [vmem:[#allocation2 + $0x94] ss:$8 sps:$4 sm:$0xff]   ;;  %v3104_v40 = vld [vmem:[#allocation2 + $0x90] ss:$8 sps:$4 sm:$0xff]   ;;  %v3105_v41 = vld [vmem:[#allocation2 + $0x84] ss:$8 sps:$4 sm:$0xff]  }
  0x80   : > { %793 = vmatprep.subr.bf16.mxu0 %v3072_v8  ;;  %v3107_v42 = vld [vmem:[#allocation2 + $0x80] ss:$8 sps:$4 sm:$0xff]   ;;  %v3111_v44 = vld [vmem:[%s3748_s18 + $0x14] ss:$8 sps:$4 sm:$0xff]   ;;  %v3113_v45 = vld [vmem:[%s3748_s18 + $0x10] ss:$8 sps:$4 sm:$0xff]  }
  0x81   : > { %v3108_v43 = vld [vmem:[%s3748_s18] ss:$8 sps:$4 sm:$0xff]   ;;  %v3114_v46 = vld [vmem:[%s3748_s18 + $0x24] ss:$8 sps:$4 sm:$0xff]   ;;  %v3117_v48 = vld [vmem:[%s3748_s18 + $0x34] ss:$8 sps:$4 sm:$0xff]  }
  0x82   : > { %2810 = vmatpush3.bf16.msra.mxu1 %v3137_v29  ;;  %v3116_v47 = vld [vmem:[%s3748_s18 + $0x20] ss:$8 sps:$4 sm:$0xff]   ;;  %v3119_v49 = vld [vmem:[%s3748_s18 + $0x30] ss:$8 sps:$4 sm:$0xff]   ;;  %v3120_v50 = vld [vmem:[%s3748_s18 + $0x44] ss:$8 sps:$4 sm:$0xff]  }
  0x83   : > { %794 = vmatpush1.bf16.msra.mxu0 %v3074_v9  ;;  %2811 = vmatprep.subr.bf16.mxu1 %v3138_v30  ;;  %v3122_v51 = vld [vmem:[%s3748_s18 + $0x40] ss:$8 sps:$4 sm:$0xff]   ;;  %v3123_v52 = vld [vmem:[%s3748_s18 + $0x54] ss:$8 sps:$4 sm:$0xff]   ;;  %v3125_v53 = vld [vmem:[%s3748_s18 + $0x50] ss:$8 sps:$4 sm:$0xff]  }
  0x84   : > { %795 = vmatprep.subr.bf16.mxu0 %v3075_v10  ;;  %v3126_v54 = vld [vmem:[%s3748_s18 + $0x64] ss:$8 sps:$4 sm:$0xff]   ;;  %v3128_v55 = vld [vmem:[%s3748_s18 + $0x60] ss:$8 sps:$4 sm:$0xff]   ;;  %v3129_v56 = vld [vmem:[%s3748_s18 + $0x74] ss:$8 sps:$4 sm:$0xff]  }
  0x85   : > { %v3131_v57 = vld [vmem:[%s3748_s18 + $0x70] ss:$8 sps:$4 sm:$0xff]   ;;  %v3144_v60 = vld [vmem:[#allocation5 + $0x48] sm:$0xff]   ;;  %v3146_v62 = vld [vmem:[#allocation5 + $0x40] sm:$0xff]   ;;  %s2411_s20 = scalar_lea.sflag [#allocation15], %s3851_s27  ;;  %s3418_s21 = scalar_lea.vmem %s4092_s30, 2048 }
  0x86   : > { %2812 = vmatpush3.bf16.msra.mxu1 %v3139_v32  ;;  %v3142_v58 = vld [vmem:[#allocation5 + $0x50] sm:$0xff]   ;;  %v3145_v61 = vld [vmem:[#allocation5 + $0x8] sm:$0xff]   ;;  %v3147_v63 = vld [vmem:[#allocation5] sm:$0xff]   ;;  %p3419_p7 = scmp.ne.s32.totalorder %s4092_s30, %s3418_s21 }
  0x87   : > { %796 = vmatpush1.bf16.msra.mxu0 %v3077_v11  ;;  %2813 = vmatprep.subr.bf16.mxu1 %v3140_v34  ;;  %v3143_v59 = vld [vmem:[#allocation5 + $0x10] sm:$0xff]   ;;  %v3148_v0 = vld [vmem:[%s4233_s4 + $0x38] sm:$0xff]  }
  0x88   : > { %797 = vmatprep.subr.bf16.mxu0 %v3078_v12  ;;  %v533_v5 = vld [vmem:[#allocation11] ss:$8 sm:$0x3]  ;;  %p3420_p8 = pnand %p3419_p7, %p3635_p5 }
  0x89   : > { %v3774_v7 = vrot.slane %v533_v5, %v3769_v3  ;;  %v3777_v8 = vrot.slane %v533_v5, %v3771_v4  ;;  %v3149_v25 = vld [vmem:[%s4233_s4 + $0x30] sm:$0xff]  }
  0x8a   : > { %2814 = vmatpush3.bf16.msra.mxu1 %v3141_v36  ;;  %p3421_p0 = pneg %p3420_p8 }
  0x8b   : > { %798 = vmatpush1.bf16.msra.mxu0 %v3080_v14  ;;  %2815 = vmatprep.subr.bf16.mxu1 %v3142_v58 }
  0x8c   : > { %799 = vmatprep.subr.bf16.mxu0 %v3081_v15 }
  0x8e   : > { %2816 = vmatpush3.bf16.msra.mxu1 %v3143_v59 }
  0x8f   : > { %800 = vmatpush1.bf16.msra.mxu0 %v3083_v16  ;;  %2817 = vmatprep.subr.bf16.mxu1 %v3144_v60 }
  0x90   : > { %801 = vmatprep.subr.bf16.mxu0 %v3084_v17 }
  0x92   : > { %2818 = vmatpush3.bf16.msra.mxu1 %v3145_v61 }
  0x93   : > { %802 = vmatpush2.bf16.msra.mxu0 %v3086_v18  ;;  %2819 = vmatprep.subr.bf16.mxu1 %v3146_v62 }
  0x94   : > { %803 = vmatprep.subr.bf16.mxu0 %v3087_v19 }
  0x96   : > { %2820 = vmatpush3.bf16.msra.mxu1 %v3147_v63 }
  0x97   : > { %804 = vmatpush2.bf16.msra.mxu0 %v3089_v21  ;;  %2895 = vmatprep.subr.bf16.mxu1 %v3148_v0 }
  0x98   : > { %805 = vmatprep.subr.bf16.mxu0 %v3090_v23 }
  0x9b   : > { %806 = vmatpush2.bf16.msra.mxu0 %v3092_v27 }
  0x9c   : > { %807 = vmatprep.subr.bf16.mxu0 %v3093_v28 }
  0x9f   : > { %808 = vmatpush2.bf16.msra.mxu0 %v3095_v31 }
  0xa0   : > { %809 = vmatprep.subr.bf16.mxu0 %v3096_v33  ;;  %v3150_v33 = vld [vmem:[%s4233_s4 + $0x28] sm:$0xff]  }
  0xa3   : > { %810 = vmatpush2.bf16.msra.mxu0 %v3098_v35 }
  0xa4   : > { %811 = vmatprep.subr.bf16.mxu0 %v3099_v37 }
  0xa7   : > { %812 = vmatpush2.bf16.msra.mxu0 %v3101_v38 }
  0xa8   : > { %813 = vmatprep.subr.bf16.mxu0 %v3102_v39 }
  0xab   : > { %814 = vmatpush2.bf16.msra.mxu0 %v3104_v40 }
  0xac   : > { %815 = vmatprep.subr.bf16.mxu0 %v3105_v41  ;;  %v3151_v41 = vld [vmem:[%s4233_s4 + $0x20] sm:$0xff]  }
  0xaf   : > { %816 = vmatpush2.bf16.msra.mxu0 %v3107_v42 }
  0xb2   : > { %818 = vmatmul.mubr.bf16.vlgmr.msra.gmra.mxu0 %v3108_v43 }
  0xb3   : > { %827 = vmatprep.mubr.bf16.mxu0 %v3111_v44 }
  0xba   : > { %828 = vmatmul.mubr.bf16.gmra.mxu0 %v3113_v45 }
  0xbb   : > { %837 = vmatprep.mubr.bf16.mxu0 %v3114_v46 }
  0xc2   : > { %838 = vmatmul.mubr.bf16.gmra.mxu0 %v3116_v47 }
  0xc3   : > { %847 = vmatprep.mubr.bf16.mxu0 %v3117_v48 }
  0xca   : > { %848 = vmatmul.mubr.bf16.gmra.mxu0 %v3119_v49  ;;  %v3152_v49 = vld [vmem:[%s4233_s4 + $0x18] sm:$0xff]  }
  0xcb   : > { %857 = vmatprep.mubr.bf16.mxu0 %v3120_v50 }
  0xd2   : > { %858 = vmatmul.mubr.bf16.gmra.mxu0 %v3122_v51 }
  0xd3   : > { %867 = vmatprep.mubr.bf16.mxu0 %v3123_v52 }
  0xda   : > { %868 = vmatmul.mubr.bf16.gmra.mxu0 %v3125_v53 }
  0xdb   : > { %877 = vmatprep.mubr.bf16.mxu0 %v3126_v54 }
  0xe2   : > { %878 = vmatmul.mubr.bf16.gmra.mxu0 %v3128_v55 }
  0xe3   : > { %887 = vmatprep.mubr.bf16.mxu0 %v3129_v56 }
  0xea   : > { %888 = vmatmul.mubr.bf16.gmra.mxu0 %v3131_v57 }
 0x172   : > { %v819_v6 = vpop.f32.mrf.mxu0 }
 0x173   : > { %v820_v13 = vadd.f32 %v819_v6, %v3777_v8 }
 0x174   : > { %v821_v9 = vpop.f32.mrf.mxu0 }
 0x175   : > { %v822_v11 = vadd.f32 %v821_v9, %v3774_v7  ;;  %v898_v20 = vmax.f32 %v820_v13, 0.0 }
 0x176   : > { %v823_v10 = vpop.f32.mrf.mxu0 }
 0x177   : > { %v824_v12 = vadd.f32 %v823_v10, %v3777_v8  ;;  %v899_v18 = vmax.f32 %v822_v11, 0.0 }
 0x178   : > { %v825_v14 = vpop.f32.mrf.mxu0 }
 0x179   : > { %v826_v15 = vadd.f32 %v825_v14, %v3774_v7  ;;  %v900_v16 = vmax.f32 %v824_v12, 0.0 }
 0x17a   : > { %v829_v17 = vpop.f32.mrf.mxu0 }
 0x17b   : > { %v901_v19 = vmax.f32 %v826_v15, 0.0  ;;  %v930_v23 = vpack.c.bf16 %v900_v16, %v898_v20  ;;  %v830_v28 = vadd.f32 %v829_v17, %v3777_v8 }
 0x17c   : > { %v831_v21 = vpop.f32.mrf.mxu0 }
 0x17d   : > { %v931_v22 = vpack.c.bf16 %v901_v19, %v899_v18  ;;  %v832_v26 = vadd.f32 %v831_v21, %v3774_v7  ;;  %v902_v36 = vmax.f32 %v830_v28, 0.0 }
 0x17e   : > { %v833_v24 = vpop.f32.mrf.mxu0 }
 0x17f   : > { %v834_v27 = vadd.f32 %v833_v24, %v3777_v8  ;;  %1107 = vmatprep.mubr.bf16.mxu1 %v931_v22  ;;  %v903_v34 = vmax.f32 %v832_v26, 0.0 }
 0x180   : > { %v835_v29 = vpop.f32.mrf.mxu0  ;;  %1108 = vmatmul.mubr.bf16.vlgmr.msra.gmra.mxu1 %v930_v23 }
 0x181   : > { %v836_v30 = vadd.f32 %v835_v29, %v3774_v7  ;;  %2896 = vmatpush3.bf16.msra.mxu1 %v3148_v0  ;;  %v904_v31 = vmax.f32 %v834_v27, 0.0 }
 0x182   : > { %v839_v32 = vpop.f32.mrf.mxu0  ;;  %2897 = vmatprep.subr.bf16.mxu1 %v3149_v25 }
 0x183   : > { %v905_v35 = vmax.f32 %v836_v30, 0.0  ;;  %v932_v39 = vpack.c.bf16 %v904_v31, %v902_v36  ;;  %v840_v44 = vadd.f32 %v839_v32, %v3777_v8 }
 0x184   : > { %v841_v37 = vpop.f32.mrf.mxu0 }
 0x185   : > { %v933_v38 = vpack.c.bf16 %v905_v35, %v903_v34  ;;  %2898 = vmatpush3.bf16.msra.mxu1 %v3149_v25  ;;  %v842_v42 = vadd.f32 %v841_v37, %v3774_v7  ;;  %v906_v52 = vmax.f32 %v840_v44, 0.0 }
 0x186   : > { %v843_v40 = vpop.f32.mrf.mxu0  ;;  %2899 = vmatprep.subr.bf16.mxu1 %v3150_v33 }
 0x187   : > { %v844_v43 = vadd.f32 %v843_v40, %v3777_v8  ;;  %1115 = vmatprep.mubr.bf16.mxu1 %v933_v38  ;;  %v907_v50 = vmax.f32 %v842_v42, 0.0 }
 0x188   : > { %v845_v45 = vpop.f32.mrf.mxu0  ;;  %1116 = vmatmul.mubr.bf16.gmra.mxu1 %v932_v39 }
 0x189   : > { %v846_v46 = vadd.f32 %v845_v45, %v3774_v7  ;;  %2900 = vmatpush3.bf16.msra.mxu1 %v3150_v33  ;;  %v908_v47 = vmax.f32 %v844_v43, 0.0 }
 0x18a   : > { %v849_v48 = vpop.f32.mrf.mxu0  ;;  %2901 = vmatprep.subr.bf16.mxu1 %v3151_v41 }
 0x18b   : > { %v909_v51 = vmax.f32 %v846_v46, 0.0  ;;  %v934_v55 = vpack.c.bf16 %v908_v47, %v906_v52  ;;  %v850_v59 = vadd.f32 %v849_v48, %v3777_v8 }
 0x18c   : > { %v851_v53 = vpop.f32.mrf.mxu0 }
 0x18d   : > { %v935_v54 = vpack.c.bf16 %v909_v51, %v907_v50  ;;  %2902 = vmatpush3.bf16.msra.mxu1 %v3151_v41  ;;  %v852_v57 = vadd.f32 %v851_v53, %v3774_v7  ;;  %v910_v2 = vmax.f32 %v850_v59, 0.0 }
 0x18e   : > { %v853_v56 = vpop.f32.mrf.mxu0  ;;  %2903 = vmatprep.subr.bf16.mxu1 %v3152_v49 }
 0x18f   : > { %v854_v58 = vadd.f32 %v853_v56, %v3777_v8  ;;  %1123 = vmatprep.mubr.bf16.mxu1 %v935_v54  ;;  %v911_v0 = vmax.f32 %v852_v57, 0.0 }
 0x190   : > { %v855_v60 = vpop.f32.mrf.mxu0  ;;  %1124 = vmatmul.mubr.bf16.gmra.mxu1 %v934_v55 }
 0x191   : > { %v856_v61 = vadd.f32 %v855_v60, %v3774_v7  ;;  %2904 = vmatpush3.bf16.msra.mxu1 %v3152_v49  ;;  %v912_v62 = vmax.f32 %v854_v58, 0.0 }
 0x192   : > { %v859_v63 = vpop.f32.mrf.mxu0 }
 0x193   : > { %v913_v1 = vmax.f32 %v856_v61, 0.0  ;;  %v936_v9 = vpack.c.bf16 %v912_v62, %v910_v2  ;;  %v860_v13 = vadd.f32 %v859_v63, %v3777_v8 }
 0x194   : > { %v861_v5 = vpop.f32.mrf.mxu0 }
 0x195   : > { %v937_v6 = vpack.c.bf16 %v913_v1, %v911_v0  ;;  %v862_v11 = vadd.f32 %v861_v5, %v3774_v7  ;;  %v914_v20 = vmax.f32 %v860_v13, 0.0  ;;  %v3153_v0 = vld [vmem:[%s4233_s4 + $0x10] sm:$0xff]  }
 0x196   : > { %v863_v10 = vpop.f32.mrf.mxu0  ;;  %2905 = vmatprep.subr.bf16.mxu1 %v3153_v0 }
 0x197   : > { %v864_v12 = vadd.f32 %v863_v10, %v3777_v8  ;;  %1131 = vmatprep.mubr.bf16.mxu1 %v937_v6  ;;  %v915_v18 = vmax.f32 %v862_v11, 0.0  ;;  %2906 = vmatpush3.bf16.msra.mxu1 %v3153_v0  ;;  %v3832_v6 = vld [vmem:[#allocation11 + $0x1] ss:$0 sm:$0xff] }
 0x198   : > { %v865_v14 = vpop.f32.mrf.mxu0  ;;  %1132 = vmatmul.mubr.bf16.gmra.mxu1 %v936_v9 }
 0x199   : > { %v866_v15 = vadd.f32 %v865_v14, %v3774_v7  ;;  %v916_v16 = vmax.f32 %v864_v12, 0.0 }
 0x19a   : > { %v869_v17 = vpop.f32.mrf.mxu0 }
 0x19b   : > { %v917_v19 = vmax.f32 %v866_v15, 0.0  ;;  %v938_v23 = vpack.c.bf16 %v916_v16, %v914_v20  ;;  %v870_v27 = vadd.f32 %v869_v17, %v3777_v8 }
 0x19c   : > { %v871_v21 = vpop.f32.mrf.mxu0 }
 0x19d   : > { %v939_v22 = vpack.c.bf16 %v917_v19, %v915_v18  ;;  %v872_v25 = vadd.f32 %v871_v21, %v3774_v7  ;;  %v918_v34 = vmax.f32 %v870_v27, 0.0 }
 0x19e   : > { %v873_v24 = vpop.f32.mrf.mxu0 }
 0x19f   : > { %v874_v26 = vadd.f32 %v873_v24, %v3777_v8  ;;  %1139 = vmatprep.mubr.bf16.mxu1 %v939_v22  ;;  %v919_v32 = vmax.f32 %v872_v25, 0.0 }
 0x1a0   : > { %v875_v28 = vpop.f32.mrf.mxu0  ;;  %1140 = vmatmul.mubr.bf16.gmra.mxu1 %v938_v23 }
 0x1a1   : > { %v876_v29 = vadd.f32 %v875_v28, %v3774_v7  ;;  %v920_v30 = vmax.f32 %v874_v26, 0.0 }
 0x1a2   : > { %v879_v31 = vpop.f32.mrf.mxu0 }
 0x1a3   : > { %v921_v33 = vmax.f32 %v876_v29, 0.0  ;;  %v940_v37 = vpack.c.bf16 %v920_v30, %v918_v34  ;;  %v880_v41 = vadd.f32 %v879_v31, %v3777_v8 }
 0x1a4   : > { %v881_v35 = vpop.f32.mrf.mxu0 }
 0x1a5   : > { %v941_v36 = vpack.c.bf16 %v921_v33, %v919_v32  ;;  %v882_v39 = vadd.f32 %v881_v35, %v3774_v7  ;;  %v922_v48 = vmax.f32 %v880_v41, 0.0 }
 0x1a6   : > { %v883_v38 = vpop.f32.mrf.mxu0 }
 0x1a7   : > { %v884_v40 = vadd.f32 %v883_v38, %v3777_v8  ;;  %1147 = vmatprep.mubr.bf16.mxu1 %v941_v36  ;;  %v923_v46 = vmax.f32 %v882_v39, 0.0 }
 0x1a8   : > { %v885_v42 = vpop.f32.mrf.mxu0  ;;  %1148 = vmatmul.mubr.bf16.gmra.mxu1 %v940_v37 }
 0x1a9   : > { %v886_v43 = vadd.f32 %v885_v42, %v3774_v7  ;;  %v924_v44 = vmax.f32 %v884_v40, 0.0 }
 0x1aa   : > { %v889_v45 = vpop.f32.mrf.mxu0 }
 0x1ab   : > { %v925_v47 = vmax.f32 %v886_v43, 0.0  ;;  %v942_v51 = vpack.c.bf16 %v924_v44, %v922_v48  ;;  %v890_v55 = vadd.f32 %v889_v45, %v3777_v8 }
 0x1ac   : > { %v891_v49 = vpop.f32.mrf.mxu0 }
 0x1ad   : > { %v943_v50 = vpack.c.bf16 %v925_v47, %v923_v46  ;;  %v892_v53 = vadd.f32 %v891_v49, %v3774_v7  ;;  %v926_v61 = vmax.f32 %v890_v55, 0.0 }
 0x1ae   : > { %v893_v52 = vpop.f32.mrf.mxu0 }
 0x1af   : > { %v894_v54 = vadd.f32 %v893_v52, %v3777_v8  ;;  %1155 = vmatprep.mubr.bf16.mxu1 %v943_v50  ;;  %v927_v59 = vmax.f32 %v892_v53, 0.0  ;;  %v3154_v8 = vld [vmem:[%s4233_s4 + $0x8] sm:$0xff]  }
 0x1b0   : > { %v895_v56 = vpop.f32.mrf.mxu0  ;;  %1156 = vmatmul.mubr.bf16.gmra.mxu1 %v942_v51  ;;  %2907 = vmatprep.subr.bf16.mxu1 %v3154_v8 }
 0x1b1   : > { %v896_v57 = vadd.f32 %v895_v56, %v3774_v7  ;;  %v928_v58 = vmax.f32 %v894_v54, 0.0  ;;  %2908 = vmatpush3.bf16.msra.mxu1 %v3154_v8  ;;  %v3155_v7 = vld [vmem:[%s4233_s4] sm:$0xff]  }
 0x1b2   : > { %2909 = vmatprep.subr.bf16.mxu1 %v3155_v7 }
 0x1b3   : > { %v929_v60 = vmax.f32 %v896_v57, 0.0  ;;  %v944_v63 = vpack.c.bf16 %v928_v58, %v926_v61 }
 0x1b5   : > { %v945_v62 = vpack.c.bf16 %v929_v60, %v927_v59  ;;  %2910 = vmatpush3.bf16.msra.mxu1 %v3155_v7 }
 0x1b7   : > { %1163 = vmatprep.mubr.bf16.mxu1 %v945_v62 }
 0x1b8   : > { %1164 = vmatmul.mubr.bf16.gmra.mxu1 %v944_v63 }
 0x240   : > { %v2821_v1 = vpop.f32.mrf.mxu1 }
 0x242   : > { %v2822_v2 = vpop.f32.mrf.mxu1 }
 0x243   : > { %v2823_v5 = vadd.f32 %v2822_v2, %v2821_v1 }
 0x244   : > { %v2824_v9 = vpop.f32.mrf.mxu1 }
 0x245   : > { %v1110_v11 = vadd.f32 %v2823_v5, %v3832_v6 }
 0x246   : > { %v2825_v10 = vpop.f32.mrf.mxu1 }
 0x247   : > { %v2826_v12 = vadd.f32 %v2825_v10, %v2824_v9  ;;  %v1172_v16 = vmax.f32 %v1110_v11, 0.0 }
 0x248   : > { %v2827_v13 = vpop.f32.mrf.mxu1 }
 0x249   : > { %v1113_v14 = vadd.f32 %v2826_v12, %v3832_v6 }
 0x24a   : > { %v2828_v15 = vpop.f32.mrf.mxu1 }
 0x24b   : > { %v1173_v17 = vmax.f32 %v1113_v14, 0.0  ;;  %v2829_v18 = vadd.f32 %v2828_v15, %v2827_v13 }
 0x24c   : > { %v2830_v19 = vpop.f32.mrf.mxu1 }
 0x24d   : > { %v1188_v20 = vpack.c.bf16 %v1173_v17, %v1172_v16  ;;  %v1118_v22 = vadd.f32 %v2829_v18, %v3832_v6 }
 0x24e   : > { %v2831_v21 = vpop.f32.mrf.mxu1 }
 0x24f   : > { %v2832_v23 = vadd.f32 %v2831_v21, %v2830_v19  ;;  %2911 = vmatprep.mubr.bf16.mxu1 %v1188_v20  ;;  %v1174_v27 = vmax.f32 %v1118_v22, 0.0 }
 0x250   : > { %v2833_v24 = vpop.f32.mrf.mxu1 }
 0x251   : > { %v1121_v25 = vadd.f32 %v2832_v23, %v3832_v6 }
 0x252   : > { %v2834_v26 = vpop.f32.mrf.mxu1 }
 0x253   : > { %v1175_v28 = vmax.f32 %v1121_v25, 0.0  ;;  %v2835_v29 = vadd.f32 %v2834_v26, %v2833_v24 }
 0x254   : > { %v2836_v30 = vpop.f32.mrf.mxu1 }
 0x255   : > { %v1189_v31 = vpack.c.bf16 %v1175_v28, %v1174_v27  ;;  %v1126_v33 = vadd.f32 %v2835_v29, %v3832_v6 }
 0x256   : > { %v2837_v32 = vpop.f32.mrf.mxu1 }
 0x257   : > { %v2838_v34 = vadd.f32 %v2837_v32, %v2836_v30  ;;  %2912 = vmatmul.mubr.bf16.vlgmr.msra.gmra.mxu1 %v1189_v31  ;;  %v1176_v38 = vmax.f32 %v1126_v33, 0.0  ;;  %v3156_v33 = vld [vmem:[#allocation7 + $0x8] sm:$0xff]  }
 0x258   : > { %v2839_v35 = vpop.f32.mrf.mxu1  ;;  %2927 = vmatprep.subr.bf16.mxu1 %v3156_v33 }
 0x259   : > { %v1129_v36 = vadd.f32 %v2838_v34, %v3832_v6  ;;  %v3157_v34 = vld [vmem:[#allocation7] sm:$0xff]   ;;  %2928 = vmatpush3.bf16.msra.mxu1 %v3156_v33 }
 0x25a   : > { %v2840_v37 = vpop.f32.mrf.mxu1  ;;  %2929 = vmatprep.subr.bf16.mxu1 %v3157_v34 }
 0x25b   : > { %v1177_v39 = vmax.f32 %v1129_v36, 0.0  ;;  %v2841_v40 = vadd.f32 %v2840_v37, %v2839_v35  ;;  %v3854_v35 = vld [vmem:[#allocation11 + $0x2] ss:$0 sm:$0xff] }
 0x25c   : > { %v2842_v41 = vpop.f32.mrf.mxu1 }
 0x25d   : > { %v1190_v42 = vpack.c.bf16 %v1177_v39, %v1176_v38  ;;  %v1134_v44 = vadd.f32 %v2841_v40, %v3832_v6  ;;  %2930 = vmatpush3.bf16.msra.mxu1 %v3157_v34 }
 0x25e   : > { %v2843_v43 = vpop.f32.mrf.mxu1 }
 0x25f   : > { %v2844_v45 = vadd.f32 %v2843_v43, %v2842_v41  ;;  %2915 = vmatprep.mubr.bf16.mxu1 %v1190_v42  ;;  %v1178_v49 = vmax.f32 %v1134_v44, 0.0 }
 0x260   : > { %v2845_v46 = vpop.f32.mrf.mxu1 }
 0x261   : > { %v1137_v47 = vadd.f32 %v2844_v45, %v3832_v6 }
 0x262   : > { %v2846_v48 = vpop.f32.mrf.mxu1 }
 0x263   : > { %v1179_v50 = vmax.f32 %v1137_v47, 0.0  ;;  %v2847_v51 = vadd.f32 %v2846_v48, %v2845_v46 }
 0x264   : > { %v2848_v52 = vpop.f32.mrf.mxu1 }
 0x265   : > { %v1191_v53 = vpack.c.bf16 %v1179_v50, %v1178_v49  ;;  %v1142_v55 = vadd.f32 %v2847_v51, %v3832_v6 }
 0x266   : > { %v2849_v54 = vpop.f32.mrf.mxu1 }
 0x267   : > { %v2850_v56 = vadd.f32 %v2849_v54, %v2848_v52  ;;  %2916 = vmatmul.mubr.bf16.gmra.mxu1 %v1191_v53  ;;  %v1180_v60 = vmax.f32 %v1142_v55, 0.0 }
 0x268   : > { %v2851_v57 = vpop.f32.mrf.mxu1 }
 0x269   : > { %v1145_v58 = vadd.f32 %v2850_v56, %v3832_v6 }
 0x26a   : > { %v2852_v59 = vpop.f32.mrf.mxu1 }
 0x26b   : > { %v1181_v61 = vmax.f32 %v1145_v58, 0.0  ;;  %v2853_v62 = vadd.f32 %v2852_v59, %v2851_v57 }
 0x26c   : > { %v2854_v63 = vpop.f32.mrf.mxu1 }
 0x26d   : > { %v1192_v0 = vpack.c.bf16 %v1181_v61, %v1180_v60  ;;  %v1150_v7 = vadd.f32 %v2853_v62, %v3832_v6 }
 0x26e   : > { %v2855_v8 = vpop.f32.mrf.mxu1 }
 0x26f   : > { %v2856_v1 = vadd.f32 %v2855_v8, %v2854_v63  ;;  %2919 = vmatprep.mubr.bf16.mxu1 %v1192_v0  ;;  %v1182_v10 = vmax.f32 %v1150_v7, 0.0 }
 0x270   : > { %v2857_v2 = vpop.f32.mrf.mxu1 }
 0x271   : > { %v1153_v5 = vadd.f32 %v2856_v1, %v3832_v6 }
 0x272   : > { %v2858_v9 = vpop.f32.mrf.mxu1 }
 0x273   : > { %v1183_v11 = vmax.f32 %v1153_v5, 0.0  ;;  %v2859_v12 = vadd.f32 %v2858_v9, %v2857_v2 }
 0x274   : > { %v2860_v13 = vpop.f32.mrf.mxu1 }
 0x275   : > { %v1193_v14 = vpack.c.bf16 %v1183_v11, %v1182_v10  ;;  %v1158_v16 = vadd.f32 %v2859_v12, %v3832_v6 }
 0x276   : > { %v2861_v15 = vpop.f32.mrf.mxu1 }
 0x277   : > { %v2862_v17 = vadd.f32 %v2861_v15, %v2860_v13  ;;  %2920 = vmatmul.mubr.bf16.gmra.mxu1 %v1193_v14  ;;  %v1184_v21 = vmax.f32 %v1158_v16, 0.0 }
 0x278   : > { %v2863_v18 = vpop.f32.mrf.mxu1 }
 0x279   : > { %v1161_v19 = vadd.f32 %v2862_v17, %v3832_v6 }
 0x27a   : > { %v2864_v20 = vpop.f32.mrf.mxu1 }
 0x27b   : > { %v1185_v22 = vmax.f32 %v1161_v19, 0.0  ;;  %v2865_v23 = vadd.f32 %v2864_v20, %v2863_v18 }
 0x27c   : > { %v2866_v24 = vpop.f32.mrf.mxu1 }
 0x27d   : > { %v1194_v25 = vpack.c.bf16 %v1185_v22, %v1184_v21  ;;  %v1166_v27 = vadd.f32 %v2865_v23, %v3832_v6 }
 0x27e   : > { %v2867_v26 = vpop.f32.mrf.mxu1 }
 0x27f   : > { %v2868_v28 = vadd.f32 %v2867_v26, %v2866_v24  ;;  %2923 = vmatprep.mubr.bf16.mxu1 %v1194_v25  ;;  %v1186_v30 = vmax.f32 %v1166_v27, 0.0 }
 0x281   : > { %v1169_v29 = vadd.f32 %v2868_v28, %v3832_v6 }
 0x283   : > { %v1187_v31 = vmax.f32 %v1169_v29, 0.0 }
 0x285   : > { %v1195_v32 = vpack.c.bf16 %v1187_v31, %v1186_v30 }
 0x287   : > { %2924 = vmatmul.mubr.bf16.gmra.mxu1 %v1195_v32 }
 0x317   : > { %v2913_v36 = vpop.f32.mrf.mxu1 }
 0x318   : > { %v3857_v6 = vadd.f32 %v2913_v36, %v3854_v35 }
 0x319   : > { %v1295_v37 = vpop.f32.mrf.mxu1 }
 0x31a   : > { %v1376_v38 = vmul.f32 0.5, %v3857_v6  ;;  %2391 = vst [vmem:[%s3862_s15 + $0x10] sm:$0xff] %v3857_v6  ;;  %v3867_v39 = vadd.f32 %v1295_v37, %v3854_v35 }
 0x31b   : > { %v2914_v40 = vpop.f32.mrf.mxu1 }
 0x31c   : > { %v1394_v41 = vmul.f32 1.442695, %v1376_v38  ;;  %v1374_v42 = vmul.f32 0.5, %v3867_v39  ;;  %2389 = vst [vmem:[%s3862_s15] sm:$0xff] %v3867_v39  ;;  %v3873_v43 = vadd.f32 %v2914_v40, %v3854_v35 }
 0x31d   : > { %v1298_v44 = vpop.f32.mrf.mxu1 }
 0x31e   : > { %3230 = vpow2.f32 %v1394_v41  ;;  %v1390_v45 = vmul.f32 1.442695, %v1374_v42  ;;  %v1377_v46 = vmul.f32 0.5, %v3873_v43  ;;  %2392 = vst [vmem:[%s3862_s15 + $0x18] sm:$0xff] %v3873_v43  ;;  %v3879_v47 = vadd.f32 %v1298_v44, %v3854_v35 }
 0x320   : > { %3232 = vpow2.f32 %v1390_v45  ;;  %v1396_v48 = vmul.f32 1.442695, %v1377_v46  ;;  %v1375_v49 = vmul.f32 0.5, %v3879_v47  ;;  %2390 = vst [vmem:[%s3862_s15 + $0x8] sm:$0xff] %v3879_v47 }
 0x322   : > { %3234 = vpow2.f32 %v1396_v48  ;;  %v1392_v50 = vmul.f32 1.442695, %v1375_v49 }
 0x324   : > { %3236 = vpow2.f32 %v1392_v50 }
 0x327   : > { %v2917_v51 = vpop.f32.mrf.mxu1 }
 0x328   : > { %v3885_v52 = vadd.f32 %v2917_v51, %v3854_v35 }
 0x329   : > { %v1311_v53 = vpop.f32.mrf.mxu1 }
 0x32a   : > { %2395 = vst [vmem:[%s3862_s15 + $0x30] sm:$0xff] %v3885_v52  ;;  %v3890_v54 = vadd.f32 %v1311_v53, %v3854_v35  ;;  %v1380_v56 = vmul.f32 0.5, %v3885_v52 }
 0x32b   : > { %v3231_v55 = vpop.eup %3230  ;;  %v2918_v57 = vpop.f32.mrf.mxu1 }
 0x32c   : > { %v1378_v58 = vmul.f32 0.5, %v3890_v54  ;;  %2393 = vst [vmem:[%s3862_s15 + $0x20] sm:$0xff] %v3890_v54  ;;  %v3897_v59 = vadd.f32 %v2918_v57, %v3854_v35  ;;  %1442 = vrot.lane.b32.xlu1 %v3231_v55, %s3536_s22  ;;  %v1402_v8 = vmul.f32 1.442695, %v1380_v56  ;;  %v3160_v56 = vld [vmem:[#allocation8 + $0x74] ss:$8 sps:$4 sm:$0xff]  }
 0x32d   : > { %v3233_v60 = vpop.eup %3232  ;;  %v1314_v61 = vpop.f32.mrf.mxu1  ;;  %1798 = vmatprep.subr.bf16.mxu1 %v3160_v56 }
 0x32e   : > { %v1398_v62 = vmul.f32 1.442695, %v1378_v58  ;;  %2396 = vst [vmem:[%s3862_s15 + $0x38] sm:$0xff] %v3897_v59  ;;  %v3903_v63 = vadd.f32 %v1314_v61, %v3854_v35  ;;  %1438 = vrot.lane.b32.xlu0 %v3233_v60, %s3536_s22  ;;  %v1381_v7 = vmul.f32 0.5, %v3897_v59 }
 0x32f   : > { %v3235_v0 = vpop.eup %3234 }
 0x330   : > { %3238 = vpow2.f32 %v1398_v62  ;;  %v1379_v1 = vmul.f32 0.5, %v3903_v63  ;;  %2394 = vst [vmem:[%s3862_s15 + $0x28] sm:$0xff] %v3903_v63  ;;  %1444 = vrot.lane.b32.xlu1 %v3235_v0, %s3536_s22  ;;  %v1404_v9 = vmul.f32 1.442695, %v1381_v7  ;;  %v1358_v62 = vld [vmem:[%s3977_s11] sm:$0xff]  ;;  %v1360_v7 = vld [vmem:[%s3977_s11 + $0x10] sm:$0xff] }
 0x331   : > { %v3237_v2 = vpop.eup %3236  ;;  %3240 = vpow2.f32 %v1402_v8  ;;  %v1361_v8 = vld [vmem:[%s3977_s11 + $0x18] sm:$0xff] }
 0x332   : > { %v1400_v5 = vmul.f32 1.442695, %v1379_v1  ;;  %1440 = vrot.lane.b32.xlu0 %v3237_v2, %s3536_s22  ;;  %v1359_v2 = vld [vmem:[%s3977_s11 + $0x8] sm:$0xff] }
 0x334   : > { %3242 = vpow2.f32 %v1400_v5 }
 0x335   : > { %3244 = vpow2.f32 %v1404_v9 }
 0x337   : > { %v2921_v10 = vpop.f32.mrf.mxu1 }
 0x338   : > { %v3913_v11 = vadd.f32 %v2921_v10, %v3854_v35 }
 0x339   : > { %v1327_v12 = vpop.f32.mrf.mxu1 }
 0x33a   : > { %2399 = vst [vmem:[%s3862_s15 + $0x50] sm:$0xff] %v3913_v11  ;;  %v3918_v13 = vadd.f32 %v1327_v12, %v3854_v35  ;;  %v1384_v14 = vmul.f32 0.5, %v3913_v11 }
 0x33b   : > { %v2922_v15 = vpop.f32.mrf.mxu1 }
 0x33c   : > { %v1382_v16 = vmul.f32 0.5, %v3918_v13  ;;  %2397 = vst [vmem:[%s3862_s15 + $0x40] sm:$0xff] %v3918_v13  ;;  %v3925_v17 = vadd.f32 %v2922_v15, %v3854_v35  ;;  %v1410_v22 = vmul.f32 1.442695, %v1384_v14 }
 0x33d   : > { %v3239_v18 = vpop.eup %3238  ;;  %v1330_v19 = vpop.f32.mrf.mxu1 }
 0x33e   : > { %v1406_v20 = vmul.f32 1.442695, %v1382_v16  ;;  %2400 = vst [vmem:[%s3862_s15 + $0x58] sm:$0xff] %v3925_v17  ;;  %v3930_v21 = vadd.f32 %v1330_v19, %v3854_v35  ;;  %1446 = vrot.lane.b32.xlu0 %v3239_v18, %s3536_s22  ;;  %v3241_v23 = vpop.eup %3240  ;;  %v1385_v24 = vmul.f32 0.5, %v3925_v17 }
 0x340   : > { %3246 = vpow2.f32 %v1406_v20  ;;  %v1383_v25 = vmul.f32 0.5, %v3930_v21  ;;  %2398 = vst [vmem:[%s3862_s15 + $0x48] sm:$0xff] %v3930_v21  ;;  %v1412_v28 = vmul.f32 1.442695, %v1385_v24  ;;  %v3163_v24 = vld [vmem:[#allocation8 + $0x64] ss:$8 sps:$4 sm:$0xff]  }
 0x341   : > { %v3243_v26 = vpop.eup %3242  ;;  %3248 = vpow2.f32 %v1410_v22  ;;  %v3158_v22 = vld [vmem:[#allocation8 + $0x70] ss:$8 sps:$4 sm:$0xff]  }
 0x342   : > { %v1408_v27 = vmul.f32 1.442695, %v1383_v25  ;;  %1448 = vrot.lane.b32.xlu1 %v3243_v26, %s3536_s22  ;;  %1450 = vrot.lane.b32.xlu0 %v3241_v23, %s3536_s22  ;;  %v3245_v29 = vpop.eup %3244  ;;  %v3161_v25 = vld [vmem:[#allocation8 + $0x60] ss:$8 sps:$4 sm:$0xff]   ;;  %v1363_v26 = vld [vmem:[%s3977_s11 + $0x28] sm:$0xff] }
 0x344   : > { %3250 = vpow2.f32 %v1408_v27  ;;  %v3169_v27 = vld [vmem:[#allocation8 + $0x44] ss:$8 sps:$4 sm:$0xff]  }
 0x345   : > { %3252 = vpow2.f32 %v1412_v28 }
 0x346   : > { %1452 = vrot.lane.b32.xlu1 %v3245_v29, %s3536_s22 }
 0x347   : > { %v2925_v30 = vpop.f32.mrf.mxu1 }
 0x348   : > { %v3941_v31 = vadd.f32 %v2925_v30, %v3854_v35  ;;  %v1364_v30 = vld [vmem:[%s3977_s11 + $0x30] sm:$0xff] }
 0x349   : > { %v1343_v32 = vpop.f32.mrf.mxu1 }
 0x34a   : > { %2403 = vst [vmem:[%s3862_s15 + $0x70] sm:$0xff] %v3941_v31  ;;  %v3946_v33 = vadd.f32 %v1343_v32, %v3854_v35  ;;  %v1388_v34 = vmul.f32 0.5, %v3941_v31 }
 0x34b   : > { %v2926_v36 = vpop.f32.mrf.mxu1 }
 0x34c   : > { %v1386_v37 = vmul.f32 0.5, %v3946_v33  ;;  %2401 = vst [vmem:[%s3862_s15 + $0x60] sm:$0xff] %v3946_v33  ;;  %v3953_v38 = vadd.f32 %v2926_v36, %v3854_v35  ;;  %v1418_v45 = vmul.f32 1.442695, %v1388_v34  ;;  %v3167_v36 = vld [vmem:[#allocation8 + $0x40] ss:$8 sps:$4 sm:$0xff]  }
 0x34d   : > { %v3247_v40 = vpop.eup %3246  ;;  %v1346_v41 = vpop.f32.mrf.mxu1 }
 0x34e   : > { %v1414_v42 = vmul.f32 1.442695, %v1386_v37  ;;  %2404 = vst [vmem:[%s3862_s15 + $0x78] sm:$0xff] %v3953_v38  ;;  %v3958_v44 = vadd.f32 %v1346_v41, %v3854_v35  ;;  %1454 = vrot.lane.b32.xlu0 %v3247_v40, %s3536_s22  ;;  %v3249_v46 = vpop.eup %3248  ;;  %v1389_v48 = vmul.f32 0.5, %v3953_v38  ;;  %v1365_v37 = vld [vmem:[%s3977_s11 + $0x38] sm:$0xff] }
 0x34f   : > { %v3172_v40 = vld [vmem:[#allocation8 + $0x34] ss:$8 sps:$4 sm:$0xff]  }
 0x350   : > { %3254 = vpow2.f32 %v1414_v42  ;;  %v1387_v49 = vmul.f32 0.5, %v3958_v44  ;;  %2402 = vst [vmem:[%s3862_s15 + $0x68] sm:$0xff] %v3958_v44  ;;  %v1420_v35 = vmul.f32 1.442695, %v1389_v48 }
 0x351   : > { %v3251_v50 = vpop.eup %3250  ;;  %3256 = vpow2.f32 %v1418_v45 }
 0x352   : > { %v1416_v51 = vmul.f32 1.442695, %v1387_v49  ;;  %1456 = vrot.lane.b32.xlu1 %v3251_v50, %s3536_s22  ;;  %1458 = vrot.lane.b32.xlu0 %v3249_v46, %s3536_s22  ;;  %v3253_v53 = vpop.eup %3252  ;;  %v3170_v50 = vld [vmem:[#allocation8 + $0x30] ss:$8 sps:$4 sm:$0xff]  }
 0x354   : > { %3258 = vpow2.f32 %v1416_v51 }
 0x355   : > { %3260 = vpow2.f32 %v1420_v35 }
 0x356   : > { %1460 = vrot.lane.b32.xlu1 %v3253_v53, %s3536_s22 }
 0x35d   : > { %v3255_v55 = vpop.eup %3254 }
 0x35e   : > { %1462 = vrot.lane.b32.xlu0 %v3255_v55, %s3536_s22  ;;  %v3257_v57 = vpop.eup %3256  ;;  %v1367_v55 = vld [vmem:[%s3977_s11 + $0x48] sm:$0xff] }
 0x361   : > { %v3259_v58 = vpop.eup %3258 }
 0x362   : > { %1464 = vrot.lane.b32.xlu1 %v3259_v58, %s3536_s22  ;;  %1466 = vrot.lane.b32.xlu0 %v3257_v57, %s3536_s22  ;;  %v3261_v60 = vpop.eup %3260  ;;  %v1368_v58 = vld [vmem:[%s3977_s11 + $0x50] sm:$0xff] }
 0x366   : > { %1468 = vrot.lane.b32.xlu1 %v3261_v60, %s3536_s22  ;;  %s3538_s22 = smov [#allocation14]  }
 0x367   : > { %s3422_s29 = sshll.u32 %s3538_s22, 4  ;;  %s3423_s29 = int_to_ptr.vmem [resolvable:$false] %s3422_s29 }
 0x368   : > { %s3424_s28 = scalar_lea.vmem %s3423_s29, 4096  ;;  %p3425_p11 = scmp.lt.s32.totalorder %s4092_s30, %s3423_s29 }
 0x369   : > { %p3426_p13 = scmp.lt.s32.totalorder %s3424_s28, %s3418_s21 }
 0x36b   : > { %p3427_p1 = por %p3426_p13, %p3425_p11 }
 0x36d   : > { %p3428_p2 = pnand %p3427_p1, %p3421_p0 }
 0x39e   : > { %v1443_v61 = vpop.permute.xlu1 %1442 }
 0x39f   : > { %v1488_v10 = vmul.f32 %v1443_v61, %v1360_v7 }
 0x3a0   : > { %v1439_v0 = vpop.permute.xlu0 %1438 }
 0x3a1   : > { %v1486_v5 = vmul.f32 %v1439_v0, %v1358_v62  ;;  %v1504_v19 = vadd.f32 %v1488_v10, %v3857_v6  ;;  %v3164_v6 = vld [vmem:[#allocation8 + $0x50] ss:$8 sps:$4 sm:$0xff]   ;;  %v1369_v62 = vld [vmem:[%s3977_s11 + $0x58] sm:$0xff] }
 0x3a2   : > { %v1445_v1 = vpop.permute.xlu1 %1444  ;;  %v1370_v10 = vld [vmem:[%s3977_s11 + $0x60] sm:$0xff] }
 0x3a3   : > { %v1489_v9 = vmul.f32 %v1445_v1, %v1361_v8  ;;  %v1502_v16 = vadd.f32 %v1486_v5, %v3867_v39  ;;  %v3166_v39 = vld [vmem:[#allocation8 + $0x54] ss:$8 sps:$4 sm:$0xff]  }
 0x3a4   : > { %v1441_v12 = vpop.permute.xlu0 %1440 }
 0x3a5   : > { %v1487_v14 = vmul.f32 %v1441_v12, %v1359_v2  ;;  %v1505_v15 = vadd.f32 %v1489_v9, %v3873_v43  ;;  %v1362_v43 = vld [vmem:[%s3977_s11 + $0x20] sm:$0xff] }
 0x3a7   : > { %v1503_v18 = vadd.f32 %v1487_v14, %v3879_v47  ;;  %v1519_v23 = vpack.c.bf16 %v1505_v15, %v1504_v19  ;;  %v1373_v19 = vld [vmem:[%s3977_s11 + $0x78] sm:$0xff] }
 0x3a9   : > { %v1518_v20 = vpack.c.bf16 %v1503_v18, %v1502_v16 }
 0x3ab   : > { %2931 = vmatprep.mubr.msk.bf16.mxu1 %vm1543_vm0, %v1518_v20 }
 0x3ac   : > { %2932 = vmatmul.mubr.msk.bf16.vlgmr.msra.gmra.mxu1 %vm1543_vm0, %v1519_v23 }
 0x3ad   : > { %1799 = vmatpush1.bf16.msra.mxu1 %v3158_v22 }
 0x3ae   : > { %1800 = vmatprep.subr.bf16.mxu1 %v3163_v24 }
 0x3b0   : > { %v1447_v47 = vpop.permute.xlu0 %1446 }
 0x3b1   : > { %1801 = vmatpush1.bf16.msra.mxu1 %v3161_v25  ;;  %v1490_v28 = vmul.f32 %v1447_v47, %v1362_v43  ;;  %v3175_v47 = vld [vmem:[#allocation8 + $0x24] ss:$8 sps:$4 sm:$0xff]  }
 0x3b2   : > { %1802 = vmatprep.subr.bf16.mxu1 %v3166_v39 }
 0x3b3   : > { %v1506_v41 = vadd.f32 %v1490_v28, %v3890_v54  ;;  %v1366_v54 = vld [vmem:[%s3977_s11 + $0x40] sm:$0xff] }
 0x3b4   : > { %v1449_v29 = vpop.permute.xlu1 %1448  ;;  %v1451_v32 = vpop.permute.xlu0 %1450  ;;  %v3184_v28 = vld [vmem:[#allocation10 + $0x74] ss:$8 sps:$4 sm:$0xff]  }
 0x3b5   : > { %v1491_v34 = vmul.f32 %v1449_v29, %v1363_v26  ;;  %1803 = vmatpush1.bf16.msra.mxu1 %v3164_v6  ;;  %v1492_v45 = vmul.f32 %v1451_v32, %v1364_v30  ;;  %v3173_v6 = vld [vmem:[#allocation8 + $0x20] ss:$8 sps:$4 sm:$0xff]   ;;  %v3176_v26 = vld [vmem:[#allocation8 + $0x10] ss:$8 sps:$4 sm:$0xff]   ;;  %v3187_v29 = vld [vmem:[#allocation10 + $0x64] ss:$8 sps:$4 sm:$0xff]   ;;  %2164 = vmatprep.subr.bf16.mxu0 %v3184_v28 }
 0x3b6   : > { %1804 = vmatprep.subr.bf16.mxu1 %v3169_v27  ;;  %v3179_v27 = vld [vmem:[#allocation8] ss:$8 sps:$4 sm:$0xff]   ;;  %v3190_v32 = vld [vmem:[#allocation10 + $0x54] ss:$8 sps:$4 sm:$0xff]  }
 0x3b7   : > { %v1507_v42 = vadd.f32 %v1491_v34, %v3903_v63  ;;  %v1508_v51 = vadd.f32 %v1492_v45, %v3885_v52  ;;  %v3185_v30 = vld [vmem:[#allocation10 + $0x60] ss:$8 sps:$4 sm:$0xff]   ;;  %v3188_v34 = vld [vmem:[#allocation10 + $0x50] ss:$8 sps:$4 sm:$0xff]  }
 0x3b8   : > { %v1453_v46 = vpop.permute.xlu1 %1452  ;;  %v3197_v45 = vld [vmem:[#allocation10 + $0x20] ss:$8 sps:$4 sm:$0xff]  }
 0x3b9   : > { %v1520_v48 = vpack.c.bf16 %v1507_v42, %v1506_v41  ;;  %v1493_v49 = vmul.f32 %v1453_v46, %v1365_v37  ;;  %1805 = vmatpush1.bf16.msra.mxu1 %v3167_v36  ;;  %v3193_v36 = vld [vmem:[#allocation10 + $0x44] ss:$8 sps:$4 sm:$0xff]   ;;  %v3191_v37 = vld [vmem:[#allocation10 + $0x40] ss:$8 sps:$4 sm:$0xff]   ;;  %v3194_v41 = vld [vmem:[#allocation10 + $0x30] ss:$8 sps:$4 sm:$0xff]  }
 0x3ba   : > { %1806 = vmatprep.subr.bf16.mxu1 %v3172_v40  ;;  %v3196_v40 = vld [vmem:[#allocation10 + $0x34] ss:$8 sps:$4 sm:$0xff]   ;;  %v3199_v42 = vld [vmem:[#allocation10 + $0x24] ss:$8 sps:$4 sm:$0xff]  }
 0x3bb   : > { %v1509_v35 = vadd.f32 %v1493_v49, %v3897_v59  ;;  %2935 = vmatprep.mubr.msk.bf16.mxu1 %vm1543_vm0, %v1520_v48  ;;  %v3202_v46 = vld [vmem:[#allocation10 + $0x14] ss:$8 sps:$4 sm:$0xff]   ;;  %v3200_v48 = vld [vmem:[#allocation10 + $0x10] ss:$8 sps:$4 sm:$0xff]   ;;  %v3205_v49 = vld [vmem:[#allocation10 + $0x4] ss:$8 sps:$4 sm:$0xff]  }
 0x3bd   : > { %v1521_v53 = vpack.c.bf16 %v1509_v35, %v1508_v51  ;;  %1807 = vmatpush1.bf16.msra.mxu1 %v3170_v50  ;;  %v3203_v50 = vld [vmem:[#allocation10] ss:$8 sps:$4 sm:$0xff]   ;;  %v3208_v51 = vld [vmem:[#allocation10 + $0xf4] ss:$8 sps:$4 sm:$0xff]   ;;  %v3206_v35 = vld [vmem:[#allocation10 + $0xf0] ss:$8 sps:$4 sm:$0xff]  }
 0x3be   : > { %1808 = vmatprep.subr.bf16.mxu1 %v3175_v47 }
 0x3bf   : > { %2936 = vmatmul.mubr.msk.bf16.gmra.mxu1 %vm1543_vm0, %v1521_v53  ;;  %v3211_v53 = vld [vmem:[#allocation10 + $0xe4] ss:$8 sps:$4 sm:$0xff]  }
 0x3c0   : > { %v1455_v63 = vpop.permute.xlu0 %1454 }
 0x3c1   : > { %v1494_v56 = vmul.f32 %v1455_v63, %v1366_v54  ;;  %1809 = vmatpush1.bf16.msra.mxu1 %v3173_v6  ;;  %v3209_v54 = vld [vmem:[#allocation10 + $0xe0] ss:$8 sps:$4 sm:$0xff]   ;;  %v3214_v63 = vld [vmem:[#allocation10 + $0xd4] ss:$8 sps:$4 sm:$0xff]  }
 0x3c3   : > { %v1510_v52 = vadd.f32 %v1494_v56, %v3918_v13  ;;  %v1371_v13 = vld [vmem:[%s3977_s11 + $0x68] sm:$0xff]  ;;  %v3217_v56 = vld [vmem:[#allocation10 + $0xc4] ss:$8 sps:$4 sm:$0xff]  }
 0x3c4   : > { %v1457_v57 = vpop.permute.xlu1 %1456  ;;  %v1459_v60 = vpop.permute.xlu0 %1458 }
 0x3c5   : > { %v1495_v61 = vmul.f32 %v1457_v57, %v1367_v55  ;;  %v1496_v0 = vmul.f32 %v1459_v60, %v1368_v58  ;;  %v3212_v55 = vld [vmem:[#allocation10 + $0xd0] ss:$8 sps:$4 sm:$0xff]   ;;  %v3215_v57 = vld [vmem:[#allocation10 + $0xc0] ss:$8 sps:$4 sm:$0xff]   ;;  %v3220_v58 = vld [vmem:[#allocation10 + $0xb4] ss:$8 sps:$4 sm:$0xff]  }
 0x3c6   : > { %v3218_v60 = vld [vmem:[#allocation10 + $0xb0] ss:$8 sps:$4 sm:$0xff]  }
 0x3c7   : > { %v1511_v59 = vadd.f32 %v1495_v61, %v3930_v21  ;;  %v1512_v2 = vadd.f32 %v1496_v0, %v3913_v11  ;;  %v1372_v21 = vld [vmem:[%s3977_s11 + $0x70] sm:$0xff] }
 0x3c8   : > { %v1461_v8 = vpop.permute.xlu1 %1460 }
 0x3c9   : > { %v1522_v7 = vpack.c.bf16 %v1511_v59, %v1510_v52  ;;  %v1497_v1 = vmul.f32 %v1461_v8, %v1369_v62  ;;  %v4020_v52 = vld [vmem:[#allocation11 + $0x3] ss:$0 sm:$0xff] }
 0x3cb   : > { %v1513_v5 = vadd.f32 %v1497_v1, %v3925_v17  ;;  %2939 = vmatprep.mubr.msk.bf16.mxu1 %vm1543_vm0, %v1522_v7 }
 0x3cd   : > { %v1523_v9 = vpack.c.bf16 %v1513_v5, %v1512_v2 }
 0x3cf   : > { %2940 = vmatmul.mubr.msk.bf16.gmra.mxu1 %vm1543_vm0, %v1523_v9 }
 0x3d0   : > { %v1463_v12 = vpop.permute.xlu0 %1462 }
 0x3d1   : > { %v1498_v14 = vmul.f32 %v1463_v12, %v1370_v10 }
 0x3d3   : > { %v1514_v20 = vadd.f32 %v1498_v14, %v3946_v33  ;;  %v3178_v33 = vld [vmem:[#allocation8 + $0x14] ss:$8 sps:$4 sm:$0xff]  }
 0x3d4   : > { %v1465_v15 = vpop.permute.xlu1 %1464  ;;  %v1467_v16 = vpop.permute.xlu0 %1466  ;;  %1810 = vmatprep.subr.bf16.mxu1 %v3178_v33 }
 0x3d5   : > { %v1499_v18 = vmul.f32 %v1465_v15, %v1371_v13  ;;  %v1500_v22 = vmul.f32 %v1467_v16, %v1372_v21  ;;  %1811 = vmatpush1.bf16.msra.mxu1 %v3176_v26 }
 0x3d7   : > { %v1515_v11 = vadd.f32 %v1499_v18, %v3958_v44  ;;  %v1516_v25 = vadd.f32 %v1500_v22, %v3941_v31  ;;  %v3181_v44 = vld [vmem:[#allocation8 + $0x4] ss:$8 sps:$4 sm:$0xff]   ;;  %v3537_v31 = vmov 0  }
 0x3d8   : > { %v1469_v17 = vpop.permute.xlu1 %1468  ;;  %1812 = vmatprep.subr.bf16.mxu1 %v3181_v44 }
 0x3d9   : > { %v1524_v23 = vpack.c.bf16 %v1515_v11, %v1514_v20  ;;  %v1501_v24 = vmul.f32 %v1469_v17, %v1373_v19  ;;  %1813 = vmatpush1.bf16.msra.mxu1 %v3179_v27 }
 0x3db   : > { %v1517_v39 = vadd.f32 %v1501_v24, %v3953_v38  ;;  %2943 = vmatprep.mubr.msk.bf16.mxu1 %vm1543_vm0, %v1524_v23  ;;  %v3182_v38 = vld [vmem:[#allocation10 + $0x70] ss:$8 sps:$4 sm:$0xff]  }
 0x3dc   : > { %2165 = vmatpush1.bf16.msra.mxu0 %v3182_v38 }
 0x3dd   : > { %v1525_v43 = vpack.c.bf16 %v1517_v39, %v1516_v25  ;;  %2166 = vmatprep.subr.bf16.mxu0 %v3187_v29 }
 0x3df   : > { %2944 = vmatmul.mubr.msk.bf16.gmra.mxu1 %vm1543_vm0, %v1525_v43 }
 0x3e0   : > { %1830 = vmatprep.mubr.bf16.mxu1 %v3537_v31  ;;  %2167 = vmatpush1.bf16.msra.mxu0 %v3185_v30 }
 0x3e1   : > { %2168 = vmatprep.subr.bf16.mxu0 %v3190_v32 }
 0x3e4   : > { %2169 = vmatpush1.bf16.msra.mxu0 %v3188_v34 }
 0x3e5   : > { %2170 = vmatprep.subr.bf16.mxu0 %v3193_v36 }
 0x3e8   : > { %2171 = vmatpush1.bf16.msra.mxu0 %v3191_v37 }
 0x3e9   : > { %2172 = vmatprep.subr.bf16.mxu0 %v3196_v40 }
 0x3ec   : > { %2173 = vmatpush1.bf16.msra.mxu0 %v3194_v41 }
 0x3ed   : > { %2174 = vmatprep.subr.bf16.mxu0 %v3199_v42 }
 0x3f0   : > { %2175 = vmatpush1.bf16.msra.mxu0 %v3197_v45 }
 0x3f1   : > { %2176 = vmatprep.subr.bf16.mxu0 %v3202_v46 }
 0x3f4   : > { %2177 = vmatpush1.bf16.msra.mxu0 %v3200_v48 }
 0x3f5   : > { %2178 = vmatprep.subr.bf16.mxu0 %v3205_v49 }
 0x3f8   : > { %2179 = vmatpush1.bf16.msra.mxu0 %v3203_v50 }
 0x3f9   : > { %2180 = vmatprep.subr.bf16.mxu0 %v3208_v51 }
 0x3fc   : > { %2181 = vmatpush2.bf16.msra.mxu0 %v3206_v35 }
 0x3fd   : > { %2182 = vmatprep.subr.bf16.mxu0 %v3211_v53 }
 0x400   : > { %2183 = vmatpush2.bf16.msra.mxu0 %v3209_v54 }
 0x401   : > { %2184 = vmatprep.subr.bf16.mxu0 %v3214_v63 }
 0x404   : > { %2185 = vmatpush2.bf16.msra.mxu0 %v3212_v55 }
 0x405   : > { %2186 = vmatprep.subr.bf16.mxu0 %v3217_v56  ;;  %v3223_v56 = vld [vmem:[#allocation10 + $0xa4] ss:$8 sps:$4 sm:$0xff]  }
 0x408   : > { %2187 = vmatpush2.bf16.msra.mxu0 %v3215_v57  ;;  %v3221_v57 = vld [vmem:[#allocation10 + $0xa0] ss:$8 sps:$4 sm:$0xff]  }
 0x409   : > { %2188 = vmatprep.subr.bf16.mxu0 %v3220_v58  ;;  %v3226_v58 = vld [vmem:[#allocation10 + $0x94] ss:$8 sps:$4 sm:$0xff]  }
 0x40c   : > { %2189 = vmatpush2.bf16.msra.mxu0 %v3218_v60  ;;  %v3224_v60 = vld [vmem:[#allocation10 + $0x90] ss:$8 sps:$4 sm:$0xff]  }
 0x40d   : > { %2190 = vmatprep.subr.bf16.mxu0 %v3223_v56 }
 0x410   : > { %2191 = vmatpush2.bf16.msra.mxu0 %v3221_v57 }
 0x411   : > { %2192 = vmatprep.subr.bf16.mxu0 %v3226_v58 }
 0x414   : > { %2193 = vmatpush2.bf16.msra.mxu0 %v3224_v60 }
 0x46c   : > { %v2933_v61 = vpop.f32.mrf.mxu1 }
 0x46d   : > { %v1611_v10 = vadd.f32 %v2933_v61, %v4020_v52  ;;  %v3229_v61 = vld [vmem:[#allocation10 + $0x84] ss:$8 sps:$4 sm:$0xff]  }
 0x46e   : > { %v1602_v62 = vpop.f32.mrf.mxu1  ;;  %2194 = vmatprep.subr.bf16.mxu0 %v3229_v61 }
 0x46f   : > { %v1603_v0 = vadd.f32 %v1602_v62, %v4020_v52  ;;  %v1667_v13 = vmax.f32 %v1611_v10, 0.0  ;;  %v3227_v62 = vld [vmem:[#allocation10 + $0x80] ss:$8 sps:$4 sm:$0xff]  }
 0x470   : > { %v2934_v59 = vpop.f32.mrf.mxu1  ;;  %2195 = vmatpush2.bf16.msra.mxu0 %v3227_v62 }
 0x471   : > { %v1665_v1 = vmax.f32 %v1603_v0, 0.0  ;;  %v1614_v5 = vadd.f32 %v2934_v59, %v4020_v52 }
 0x472   : > { %v1605_v8 = vpop.f32.mrf.mxu1 }
 0x473   : > { %v1606_v7 = vadd.f32 %v1605_v8, %v4020_v52  ;;  %v1668_v12 = vmax.f32 %v1614_v5, 0.0 }
 0x475   : > { %v1666_v2 = vmax.f32 %v1606_v7, 0.0  ;;  %v1682_v14 = vpack.c.bf16 %v1668_v12, %v1667_v13 }
 0x477   : > { %v1681_v9 = vpack.c.bf16 %v1666_v2, %v1665_v1 }
 0x479   : > { %1831 = vmatmul.mubr.bf16.vlgmr.msra.gmra.mxu1 %v1681_v9 }
 0x47a   : > { %1840 = vmatprep.mubr.bf16.mxu1 %v3537_v31 }
 0x47f   : > { %v2937_v15 = vpop.f32.mrf.mxu1 }
 0x480   : > { %v1627_v24 = vadd.f32 %v2937_v15, %v4020_v52 }
 0x481   : > { %v1618_v21 = vpop.f32.mrf.mxu1  ;;  %1841 = vmatmul.mubr.bf16.gmra.mxu1 %v1682_v14 }
 0x482   : > { %1850 = vmatprep.mubr.bf16.mxu1 %v3537_v31  ;;  %v1619_v18 = vadd.f32 %v1618_v21, %v4020_v52  ;;  %v1671_v43 = vmax.f32 %v1627_v24, 0.0 }
 0x483   : > { %v2938_v16 = vpop.f32.mrf.mxu1 }
 0x484   : > { %v1669_v11 = vmax.f32 %v1619_v18, 0.0  ;;  %v1630_v17 = vadd.f32 %v2938_v16, %v4020_v52 }
 0x485   : > { %v1621_v19 = vpop.f32.mrf.mxu1 }
 0x486   : > { %v1622_v20 = vadd.f32 %v1621_v19, %v4020_v52  ;;  %v1672_v25 = vmax.f32 %v1630_v17, 0.0 }
 0x488   : > { %v1670_v22 = vmax.f32 %v1622_v20, 0.0  ;;  %v1684_v6 = vpack.c.bf16 %v1672_v25, %v1671_v43 }
 0x48a   : > { %v1683_v23 = vpack.c.bf16 %v1670_v22, %v1669_v11 }
 0x48c   : > { %1851 = vmatmul.mubr.bf16.gmra.mxu1 %v1683_v23 }
 0x48d   : > { %1860 = vmatprep.mubr.bf16.mxu1 %v3537_v31 }
 0x48f   : > { %v2941_v39 = vpop.f32.mrf.mxu1 }
 0x490   : > { %v1643_v32 = vadd.f32 %v2941_v39, %v4020_v52 }
 0x491   : > { %v1634_v47 = vpop.f32.mrf.mxu1 }
 0x492   : > { %v1635_v26 = vadd.f32 %v1634_v47, %v4020_v52  ;;  %v1675_v37 = vmax.f32 %v1643_v32, 0.0 }
 0x493   : > { %v2942_v33 = vpop.f32.mrf.mxu1 }
 0x494   : > { %1861 = vmatmul.mubr.bf16.gmra.mxu1 %v1684_v6  ;;  %v1673_v38 = vmax.f32 %v1635_v26, 0.0  ;;  %v1646_v29 = vadd.f32 %v2942_v33, %v4020_v52 }
 0x495   : > { %v1637_v44 = vpop.f32.mrf.mxu1  ;;  %1870 = vmatprep.mubr.bf16.mxu1 %v3537_v31 }
 0x496   : > { %v1638_v27 = vadd.f32 %v1637_v44, %v4020_v52  ;;  %v1676_v34 = vmax.f32 %v1646_v29, 0.0 }
 0x498   : > { %v1674_v28 = vmax.f32 %v1638_v27, 0.0  ;;  %v1686_v41 = vpack.c.bf16 %v1676_v34, %v1675_v37 }
 0x49a   : > { %v1685_v30 = vpack.c.bf16 %v1674_v28, %v1673_v38 }
 0x49c   : > { %1871 = vmatmul.mubr.bf16.gmra.mxu1 %v1685_v30 }
 0x49d   : > { %1880 = vmatprep.mubr.bf16.mxu1 %v3537_v31 }
 0x49f   : > { %v2945_v36 = vpop.f32.mrf.mxu1 }
 0x4a0   : > { %v1659_v53 = vadd.f32 %v2945_v36, %v4020_v52 }
 0x4a1   : > { %v1650_v40 = vpop.f32.mrf.mxu1 }
 0x4a2   : > { %v1651_v45 = vadd.f32 %v1650_v40, %v4020_v52  ;;  %v1679_v63 = vmax.f32 %v1659_v53, 0.0 }
 0x4a3   : > { %v2946_v42 = vpop.f32.mrf.mxu1 }
 0x4a4   : > { %1881 = vmatmul.mubr.bf16.gmra.mxu1 %v1686_v41  ;;  %v1677_v49 = vmax.f32 %v1651_v45, 0.0  ;;  %v1662_v51 = vadd.f32 %v2946_v42, %v4020_v52 }
 0x4a5   : > { %v1653_v46 = vpop.f32.mrf.mxu1  ;;  %1890 = vmatprep.mubr.bf16.mxu1 %v3537_v31 }
 0x4a6   : > { %v1654_v48 = vadd.f32 %v1653_v46, %v4020_v52  ;;  %v1680_v54 = vmax.f32 %v1662_v51, 0.0  ;;  %v1706_v52 = vld [vmem:[#allocation11 + $0x4] ss:$8 sm:$0x3] }
 0x4a7   : > { %v4049_v0 = vrot.slane %v1706_v52, %v3771_v4 }
 0x4a8   : > { %v1678_v50 = vmax.f32 %v1654_v48, 0.0  ;;  %v1688_v55 = vpack.c.bf16 %v1680_v54, %v1679_v63 }
 0x4aa   : > { %v1687_v35 = vpack.c.bf16 %v1678_v50, %v1677_v49 }
 0x4ac   : > { %1891 = vmatmul.mubr.bf16.gmra.mxu1 %v1687_v35 }
 0x4ad   : > { %1900 = vmatprep.mubr.bf16.mxu1 %v3537_v31  ;;  %v4046_v31 = vrot.slane %v1706_v52, %v3769_v3 }
 0x4b4   : > { %1901 = vmatmul.mubr.bf16.gmra.mxu1 %v1688_v55 }
 0x539   : > { %v1832_v59 = vpop.f32.mrf.mxu1 }
 0x53a   : > { %v1833_v5 = vadd.f32 %v1832_v59, %v4049_v0 }
 0x53b   : > { %v1834_v8 = vpop.f32.mrf.mxu1 }
 0x53c   : > { %v1835_v1 = vadd.f32 %v1834_v8, %v4046_v31  ;;  %v1911_v21 = vmax.f32 %v1833_v5, 0.0 }
 0x53d   : > { %v1836_v7 = vpop.f32.mrf.mxu1 }
 0x53e   : > { %v1837_v2 = vadd.f32 %v1836_v7, %v4049_v0  ;;  %v1912_v14 = vmax.f32 %v1835_v1, 0.0 }
 0x53f   : > { %v1838_v9 = vpop.f32.mrf.mxu1 }
 0x540   : > { %v1839_v10 = vadd.f32 %v1838_v9, %v4046_v31  ;;  %v1913_v12 = vmax.f32 %v1837_v2, 0.0 }
 0x541   : > { %v1842_v13 = vpop.f32.mrf.mxu1 }
 0x542   : > { %v1914_v15 = vmax.f32 %v1839_v10, 0.0  ;;  %v1943_v19 = vpack.c.bf16 %v1913_v12, %v1911_v21  ;;  %v1843_v17 = vadd.f32 %v1842_v13, %v4049_v0 }
 0x543   : > { %v1844_v16 = vpop.f32.mrf.mxu1 }
 0x544   : > { %v1944_v18 = vpack.c.bf16 %v1914_v15, %v1912_v14  ;;  %v1845_v11 = vadd.f32 %v1844_v16, %v4046_v31  ;;  %v1915_v47 = vmax.f32 %v1843_v17, 0.0 }
 0x545   : > { %v1846_v20 = vpop.f32.mrf.mxu1 }
 0x546   : > { %v1847_v22 = vadd.f32 %v1846_v20, %v4049_v0  ;;  %2196 = vmatprep.mubr.bf16.mxu0 %v1944_v18  ;;  %v1916_v39 = vmax.f32 %v1845_v11, 0.0 }
 0x547   : > { %v1848_v23 = vpop.f32.mrf.mxu1  ;;  %2197 = vmatmul.mubr.bf16.vlgmr.msra.gmra.mxu0 %v1943_v19 }
 0x548   : > { %v1849_v24 = vadd.f32 %v1848_v23, %v4046_v31  ;;  %v1917_v25 = vmax.f32 %v1847_v22, 0.0 }
 0x54a   : > { %v1918_v43 = vmax.f32 %v1849_v24, 0.0  ;;  %v1945_v26 = vpack.c.bf16 %v1917_v25, %v1915_v47 }
 0x54c   : > { %v1946_v6 = vpack.c.bf16 %v1918_v43, %v1916_v39  ;;  %v1852_v33 = vpop.f32.mrf.mxu1 }
 0x54d   : > { %v1853_v29 = vadd.f32 %v1852_v33, %v4049_v0 }
 0x54e   : > { %v1854_v44 = vpop.f32.mrf.mxu1  ;;  %2206 = vmatprep.mubr.bf16.mxu0 %v1946_v6 }
 0x54f   : > { %2207 = vmatmul.mubr.bf16.gmra.mxu0 %v1945_v26  ;;  %v1855_v38 = vadd.f32 %v1854_v44, %v4046_v31  ;;  %v1919_v41 = vmax.f32 %v1853_v29, 0.0 }
 0x550   : > { %v1856_v27 = vpop.f32.mrf.mxu1 }
 0x551   : > { %v1857_v28 = vadd.f32 %v1856_v27, %v4049_v0  ;;  %v1920_v37 = vmax.f32 %v1855_v38, 0.0 }
 0x552   : > { %v1858_v30 = vpop.f32.mrf.mxu1 }
 0x553   : > { %v1859_v32 = vadd.f32 %v1858_v30, %v4046_v31  ;;  %v1921_v34 = vmax.f32 %v1857_v28, 0.0 }
 0x554   : > { %v1862_v36 = vpop.f32.mrf.mxu1 }
 0x555   : > { %v1922_v40 = vmax.f32 %v1859_v32, 0.0  ;;  %v1947_v46 = vpack.c.bf16 %v1921_v34, %v1919_v41  ;;  %v1863_v51 = vadd.f32 %v1862_v36, %v4049_v0 }
 0x556   : > { %v1864_v42 = vpop.f32.mrf.mxu1 }
 0x557   : > { %v1948_v45 = vpack.c.bf16 %v1922_v40, %v1920_v37  ;;  %v1865_v49 = vadd.f32 %v1864_v42, %v4046_v31  ;;  %v1923_v57 = vmax.f32 %v1863_v51, 0.0 }
 0x558   : > { %v1866_v48 = vpop.f32.mrf.mxu1 }
 0x559   : > { %v1867_v50 = vadd.f32 %v1866_v48, %v4049_v0  ;;  %2216 = vmatprep.mubr.bf16.mxu0 %v1948_v45  ;;  %v1924_v55 = vmax.f32 %v1865_v49, 0.0 }
 0x55a   : > { %v1868_v35 = vpop.f32.mrf.mxu1  ;;  %2217 = vmatmul.mubr.bf16.gmra.mxu0 %v1947_v46 }
 0x55b   : > { %v1869_v53 = vadd.f32 %v1868_v35, %v4046_v31  ;;  %v1925_v54 = vmax.f32 %v1867_v50, 0.0 }
 0x55c   : > { %v1872_v63 = vpop.f32.mrf.mxu1 }
 0x55d   : > { %v1926_v56 = vmax.f32 %v1869_v53, 0.0  ;;  %v1949_v61 = vpack.c.bf16 %v1925_v54, %v1923_v57  ;;  %v1873_v8 = vadd.f32 %v1872_v63, %v4049_v0 }
 0x55e   : > { %v1874_v58 = vpop.f32.mrf.mxu1 }
 0x55f   : > { %v1950_v60 = vpack.c.bf16 %v1926_v56, %v1924_v55  ;;  %v1875_v52 = vadd.f32 %v1874_v58, %v4046_v31  ;;  %v1927_v12 = vmax.f32 %v1873_v8, 0.0 }
 0x560   : > { %v1876_v62 = vpop.f32.mrf.mxu1 }
 0x561   : > { %v1877_v59 = vadd.f32 %v1876_v62, %v4049_v0  ;;  %2226 = vmatprep.mubr.bf16.mxu0 %v1950_v60  ;;  %v1928_v9 = vmax.f32 %v1875_v52, 0.0 }
 0x562   : > { %v1878_v7 = vpop.f32.mrf.mxu1  ;;  %2227 = vmatmul.mubr.bf16.gmra.mxu0 %v1949_v61 }
 0x563   : > { %v1879_v1 = vadd.f32 %v1878_v7, %v4046_v31  ;;  %v1929_v2 = vmax.f32 %v1877_v59, 0.0 }
 0x564   : > { %v1882_v5 = vpop.f32.mrf.mxu1 }
 0x565   : > { %v1930_v10 = vmax.f32 %v1879_v1, 0.0  ;;  %v1951_v15 = vpack.c.bf16 %v1929_v2, %v1927_v12  ;;  %v1883_v19 = vadd.f32 %v1882_v5, %v4049_v0 }
 0x566   : > { %v1884_v13 = vpop.f32.mrf.mxu1 }
 0x567   : > { %v1952_v14 = vpack.c.bf16 %v1930_v10, %v1928_v9  ;;  %v1885_v16 = vadd.f32 %v1884_v13, %v4046_v31  ;;  %v1931_v25 = vmax.f32 %v1883_v19, 0.0 }
 0x568   : > { %v1886_v21 = vpop.f32.mrf.mxu1 }
 0x569   : > { %v1887_v18 = vadd.f32 %v1886_v21, %v4049_v0  ;;  %2236 = vmatprep.mubr.bf16.mxu0 %v1952_v14  ;;  %v1932_v23 = vmax.f32 %v1885_v16, 0.0 }
 0x56a   : > { %v1888_v20 = vpop.f32.mrf.mxu1  ;;  %2237 = vmatmul.mubr.bf16.gmra.mxu0 %v1951_v15 }
 0x56b   : > { %v1889_v11 = vadd.f32 %v1888_v20, %v4046_v31  ;;  %v1933_v22 = vmax.f32 %v1887_v18, 0.0 }
 0x56c   : > { %v1892_v17 = vpop.f32.mrf.mxu1 }
 0x56d   : > { %v1934_v24 = vmax.f32 %v1889_v11, 0.0  ;;  %v1953_v47 = vpack.c.bf16 %v1933_v22, %v1931_v25  ;;  %v1893_v44 = vadd.f32 %v1892_v17, %v4049_v0 }
 0x56e   : > { %v1894_v39 = vpop.f32.mrf.mxu1 }
 0x56f   : > { %v1954_v43 = vpack.c.bf16 %v1934_v24, %v1932_v23  ;;  %v1895_v33 = vadd.f32 %v1894_v39, %v4046_v31  ;;  %v1935_v34 = vmax.f32 %v1893_v44, 0.0 }
 0x570   : > { %v1896_v6 = vpop.f32.mrf.mxu1 }
 0x571   : > { %v1897_v26 = vadd.f32 %v1896_v6, %v4049_v0  ;;  %2246 = vmatprep.mubr.bf16.mxu0 %v1954_v43  ;;  %v1936_v30 = vmax.f32 %v1895_v33, 0.0 }
 0x572   : > { %v1898_v27 = vpop.f32.mrf.mxu1  ;;  %2247 = vmatmul.mubr.bf16.gmra.mxu0 %v1953_v47 }
 0x573   : > { %v1899_v38 = vadd.f32 %v1898_v27, %v4046_v31  ;;  %v1937_v28 = vmax.f32 %v1897_v26, 0.0 }
 0x574   : > { %v1902_v29 = vpop.f32.mrf.mxu1 }
 0x575   : > { %v1938_v32 = vmax.f32 %v1899_v38, 0.0  ;;  %v1955_v40 = vpack.c.bf16 %v1937_v28, %v1935_v34  ;;  %v1903_v46 = vadd.f32 %v1902_v29, %v4049_v0 }
 0x576   : > { %v1904_v36 = vpop.f32.mrf.mxu1 }
 0x577   : > { %v1956_v37 = vpack.c.bf16 %v1938_v32, %v1936_v30  ;;  %v1905_v42 = vadd.f32 %v1904_v36, %v4046_v31  ;;  %v1939_v53 = vmax.f32 %v1903_v46, 0.0 }
 0x578   : > { %v1906_v41 = vpop.f32.mrf.mxu1 }
 0x579   : > { %v1907_v45 = vadd.f32 %v1906_v41, %v4049_v0  ;;  %2256 = vmatprep.mubr.bf16.mxu0 %v1956_v37  ;;  %v1940_v51 = vmax.f32 %v1905_v42, 0.0 }
 0x57a   : > { %v1908_v48 = vpop.f32.mrf.mxu1  ;;  %2257 = vmatmul.mubr.bf16.gmra.mxu0 %v1955_v40 }
 0x57b   : > { %v1909_v49 = vadd.f32 %v1908_v48, %v4046_v31  ;;  %v1941_v50 = vmax.f32 %v1907_v45, 0.0 }
 0x57d   : > { %v1942_v35 = vmax.f32 %v1909_v49, 0.0  ;;  %v1957_v63 = vpack.c.bf16 %v1941_v50, %v1939_v53 }
 0x57f   : > { %v1958_v54 = vpack.c.bf16 %v1942_v35, %v1940_v51 }
 0x581   : > { %2266 = vmatprep.mubr.bf16.mxu0 %v1958_v54 }
 0x582   : > { %2267 = vmatmul.mubr.bf16.gmra.mxu0 %v1957_v63 }
 0x583   : > { %3431 = shalt.err (!%p3428_p2)
}
 0x584   : > { %s3432_s15 = scalar_lea.hbm %s4089_s12, 2048  ;;  %s3436_s18 = scalar_lea.hbm %s4239_s10, 4096 }
 0x585   : > { %p3433_p3 = scmp.ne.s32.totalorder %s4089_s12, %s3432_s15  ;;  %p3437_p9 = scmp.lt.s32.totalorder %s4089_s12, %s4239_s10 }
 0x586   : > { %p3438_p4 = scmp.lt.s32.totalorder %s3436_s18, %s3432_s15 }
 0x587   : > { %p3434_p12 = pnand %p3433_p3, %p3635_p5 }
 0x588   : > { %p3439_p7 = por %p3438_p4, %p3437_p9 }
 0x589   : > { %p3435_p10 = pneg %p3434_p12 }
 0x58b   : > { %p3440_p8 = pnand %p3439_p7, %p3435_p10 }
 0x58d   : > { %3443 = shalt.err (!%p3440_p8)
}
 0x58e   : > { %s3539_s21 = smov 128   ;;  %s3540_s29 = smov 8   ;;  %v1992_v31 = vld [vmem:[#allocation11 + $0x5] ss:$8 sm:$0x3] }
 0x58f   : > { %2972 = dma.vmem_to_hbm [thread:$0]  (%p3635_p5), %s4092_s30, 2048, %s4089_s12, %s2411_s20, %s3539_s21, %s3539_s21, %s3540_s29   ;;  %v4121_v0 = vrot.slane %v1992_v31, %v3771_v4  ;;  %v4124_v55 = vrot.slane %v1992_v31, %v3769_v3 }
 0x590   : > { %s4130_s19 = scalar_lea.vmem [#allocation13], %s2623_s26  ;;  %s4265_s12 = sshll.u32 %s3618_s17, 11 }
 0x591   : > { %s2425_s26 = sshll.u32 %s4130_s19, 4  ;;  %s4183_s28 = scalar_lea.hbm %s4238_s9, %s4265_s12  ;;  %s4185_s26 = int_to_ptr.vmem [resolvable:$true] %s2425_s26 }
 0x592   : > { %s2406_s15 = scalar_lea.sflag [#allocation4], %s3851_s27  ;;  %s3444_s11 = scalar_lea.vmem %s4185_s26, 2048 }
 0x593   : > { %p3445_p0 = scmp.ne.s32.totalorder %s4185_s26, %s3444_s11  ;;  %s3541_s25 = smov [#allocation13]  }
 0x594   : > { %s3448_s18 = sshll.u32 %s3541_s25, 4  ;;  %s3449_s18 = int_to_ptr.vmem [resolvable:$false] %s3448_s18 }
 0x595   : > { %p3446_p11 = pnand %p3445_p0, %p3635_p5  ;;  %s3450_s17 = scalar_lea.vmem %s3449_s18, 4096 }
 0x596   : > { %p3451_p1 = scmp.lt.s32.totalorder %s4185_s26, %s3449_s18  ;;  %p3452_p2 = scmp.lt.s32.totalorder %s3450_s17, %s3444_s11 }
 0x597   : > { %p3447_p13 = pneg %p3446_p11 }
 0x598   : > { %p3453_p3 = por %p3452_p2, %p3451_p1 }
 0x59a   : > { %p3454_p12 = pnand %p3453_p3, %p3447_p13 }
 0x607   : > { %v2198_v56 = vpop.f32.mrf.mxu0 }
 0x608   : > { %v2199_v58 = vadd.f32 %v2198_v56, %v4121_v0 }
 0x609   : > { %v2200_v57 = vpop.f32.mrf.mxu0 }
 0x60a   : > { %v2201_v60 = vadd.f32 %v2200_v57, %v4124_v55 }
 0x60b   : > { %v2202_v61 = vpop.f32.mrf.mxu0 }
 0x60c   : > { %v2786_v62 = vpack.c.bf16 %v2201_v60, %v2199_v58  ;;  %v2203_v3 = vadd.f32 %v2202_v61, %v4121_v0 }
 0x60d   : > { %v2204_v52 = vpop.f32.mrf.mxu0 }
 0x60e   : > { %2373 = vst [vmem:[%s4130_s19] sm:$0xff] %v2786_v62  ;;  %v2205_v4 = vadd.f32 %v2204_v52, %v4124_v55 }
 0x60f   : > { %v2208_v59 = vpop.f32.mrf.mxu0 }
 0x610   : > { %v2787_v8 = vpack.c.bf16 %v2205_v4, %v2203_v3  ;;  %v2209_v1 = vadd.f32 %v2208_v59, %v4121_v0 }
 0x611   : > { %v2210_v7 = vpop.f32.mrf.mxu0 }
 0x612   : > { %2374 = vst [vmem:[%s4130_s19 + $0x8] sm:$0xff] %v2787_v8  ;;  %v2211_v2 = vadd.f32 %v2210_v7, %v4124_v55 }
 0x613   : > { %v2212_v5 = vpop.f32.mrf.mxu0 }
 0x614   : > { %v2788_v9 = vpack.c.bf16 %v2211_v2, %v2209_v1  ;;  %v2213_v12 = vadd.f32 %v2212_v5, %v4121_v0 }
 0x615   : > { %v2214_v10 = vpop.f32.mrf.mxu0 }
 0x616   : > { %2375 = vst [vmem:[%s4130_s19 + $0x10] sm:$0xff] %v2788_v9  ;;  %v2215_v13 = vadd.f32 %v2214_v10, %v4124_v55 }
 0x618   : > { %v2789_v14 = vpack.c.bf16 %v2215_v13, %v2213_v12 }
 0x61a   : > { %2376 = vst [vmem:[%s4130_s19 + $0x18] sm:$0xff] %v2789_v14  ;;  %v2218_v15 = vpop.f32.mrf.mxu0 }
 0x61b   : > { %v2219_v16 = vadd.f32 %v2218_v15, %v4121_v0 }
 0x61c   : > { %v2220_v21 = vpop.f32.mrf.mxu0 }
 0x61d   : > { %v2221_v18 = vadd.f32 %v2220_v21, %v4124_v55 }
 0x61e   : > { %v2222_v19 = vpop.f32.mrf.mxu0 }
 0x61f   : > { %v2790_v20 = vpack.c.bf16 %v2221_v18, %v2219_v16  ;;  %v2223_v22 = vadd.f32 %v2222_v19, %v4121_v0 }
 0x620   : > { %v2224_v11 = vpop.f32.mrf.mxu0 }
 0x621   : > { %2377 = vst [vmem:[%s4130_s19 + $0x20] sm:$0xff] %v2790_v20  ;;  %v2225_v17 = vadd.f32 %v2224_v11, %v4124_v55 }
 0x622   : > { %v2228_v23 = vpop.f32.mrf.mxu0 }
 0x623   : > { %v2791_v24 = vpack.c.bf16 %v2225_v17, %v2223_v22  ;;  %v2229_v39 = vadd.f32 %v2228_v23, %v4121_v0 }
 0x624   : > { %v2230_v25 = vpop.f32.mrf.mxu0 }
 0x625   : > { %2378 = vst [vmem:[%s4130_s19 + $0x28] sm:$0xff] %v2791_v24  ;;  %v2231_v43 = vadd.f32 %v2230_v25, %v4124_v55 }
 0x626   : > { %v2232_v47 = vpop.f32.mrf.mxu0 }
 0x627   : > { %v2792_v6 = vpack.c.bf16 %v2231_v43, %v2229_v39  ;;  %v2233_v26 = vadd.f32 %v2232_v47, %v4121_v0 }
 0x628   : > { %v2234_v33 = vpop.f32.mrf.mxu0 }
 0x629   : > { %2379 = vst [vmem:[%s4130_s19 + $0x30] sm:$0xff] %v2792_v6  ;;  %v2235_v44 = vadd.f32 %v2234_v33, %v4124_v55 }
 0x62a   : > { %v2238_v27 = vpop.f32.mrf.mxu0 }
 0x62b   : > { %v2793_v38 = vpack.c.bf16 %v2235_v44, %v2233_v26  ;;  %v2239_v29 = vadd.f32 %v2238_v27, %v4121_v0 }
 0x62c   : > { %v2240_v28 = vpop.f32.mrf.mxu0 }
 0x62d   : > { %2380 = vst [vmem:[%s4130_s19 + $0x38] sm:$0xff] %v2793_v38  ;;  %v2241_v30 = vadd.f32 %v2240_v28, %v4124_v55 }
 0x62e   : > { %v2242_v32 = vpop.f32.mrf.mxu0 }
 0x62f   : > { %v2794_v34 = vpack.c.bf16 %v2241_v30, %v2239_v29  ;;  %v2243_v37 = vadd.f32 %v2242_v32, %v4121_v0 }
 0x630   : > { %v2244_v36 = vpop.f32.mrf.mxu0 }
 0x631   : > { %2381 = vst [vmem:[%s4130_s19 + $0x40] sm:$0xff] %v2794_v34  ;;  %v2245_v40 = vadd.f32 %v2244_v36, %v4124_v55 }
 0x632   : > { %v2248_v41 = vpop.f32.mrf.mxu0 }
 0x633   : > { %v2795_v42 = vpack.c.bf16 %v2245_v40, %v2243_v37  ;;  %v2249_v46 = vadd.f32 %v2248_v41, %v4121_v0 }
 0x634   : > { %v2250_v45 = vpop.f32.mrf.mxu0 }
 0x635   : > { %2382 = vst [vmem:[%s4130_s19 + $0x48] sm:$0xff] %v2795_v42  ;;  %v2251_v48 = vadd.f32 %v2250_v45, %v4124_v55 }
 0x636   : > { %v2252_v49 = vpop.f32.mrf.mxu0 }
 0x637   : > { %v2796_v50 = vpack.c.bf16 %v2251_v48, %v2249_v46  ;;  %v2253_v35 = vadd.f32 %v2252_v49, %v4121_v0 }
 0x638   : > { %v2254_v51 = vpop.f32.mrf.mxu0 }
 0x639   : > { %2383 = vst [vmem:[%s4130_s19 + $0x50] sm:$0xff] %v2796_v50  ;;  %v2255_v53 = vadd.f32 %v2254_v51, %v4124_v55 }
 0x63a   : > { %v2258_v54 = vpop.f32.mrf.mxu0 }
 0x63b   : > { %v2797_v63 = vpack.c.bf16 %v2255_v53, %v2253_v35  ;;  %v2259_v56 = vadd.f32 %v2258_v54, %v4121_v0 }
 0x63c   : > { %v2260_v31 = vpop.f32.mrf.mxu0 }
 0x63d   : > { %2384 = vst [vmem:[%s4130_s19 + $0x58] sm:$0xff] %v2797_v63  ;;  %v2261_v57 = vadd.f32 %v2260_v31, %v4124_v55 }
 0x63e   : > { %v2262_v58 = vpop.f32.mrf.mxu0 }
 0x63f   : > { %v2798_v60 = vpack.c.bf16 %v2261_v57, %v2259_v56  ;;  %v2263_v62 = vadd.f32 %v2262_v58, %v4121_v0 }
 0x640   : > { %v2264_v61 = vpop.f32.mrf.mxu0 }
 0x641   : > { %2385 = vst [vmem:[%s4130_s19 + $0x60] sm:$0xff] %v2798_v60  ;;  %v2265_v52 = vadd.f32 %v2264_v61, %v4124_v55 }
 0x642   : > { %v2268_v3 = vpop.f32.mrf.mxu0 }
 0x643   : > { %v2799_v4 = vpack.c.bf16 %v2265_v52, %v2263_v62  ;;  %v2269_v8 = vadd.f32 %v2268_v3, %v4121_v0 }
 0x644   : > { %v2270_v59 = vpop.f32.mrf.mxu0 }
 0x645   : > { %2386 = vst [vmem:[%s4130_s19 + $0x68] sm:$0xff] %v2799_v4  ;;  %v2271_v7 = vadd.f32 %v2270_v59, %v4124_v55 }
 0x646   : > { %v2272_v1 = vpop.f32.mrf.mxu0 }
 0x647   : > { %v2800_v2 = vpack.c.bf16 %v2271_v7, %v2269_v8  ;;  %v2273_v9 = vadd.f32 %v2272_v1, %v4121_v0 }
 0x648   : > { %v2274_v5 = vpop.f32.mrf.mxu0 }
 0x649   : > { %2387 = vst [vmem:[%s4130_s19 + $0x70] sm:$0xff] %v2800_v2  ;;  %v2275_v10 = vadd.f32 %v2274_v5, %v4124_v55 }
 0x64b   : > { %v2801_v12 = vpack.c.bf16 %v2275_v10, %v2273_v9 }
 0x64d   : > { %2388 = vst [vmem:[%s4130_s19 + $0x78] sm:$0xff] %v2801_v12 }
 0x64e   : > { %3457 = shalt.err (!%p3454_p12)
}
 0x64f   : > { %s3458_s22 = scalar_lea.hbm %s4183_s28, 2048  ;;  %s3462_s12 = scalar_lea.hbm %s4238_s9, 4096 }
 0x650   : > { %p3459_p10 = scmp.ne.s32.totalorder %s4183_s28, %s3458_s22  ;;  %p3463_p7 = scmp.lt.s32.totalorder %s4183_s28, %s4238_s9 }
 0x651   : > { %p3464_p8 = scmp.lt.s32.totalorder %s3462_s12, %s3458_s22 }
 0x652   : > { %p3460_p9 = pnand %p3459_p10, %p3635_p5 }
 0x653   : > { %p3465_p0 = por %p3464_p8, %p3463_p7 }
 0x654   : > { %p3461_p4 = pneg %p3460_p9 }
 0x656   : > { %p3466_p11 = pnand %p3465_p0, %p3461_p4 }
 0x658   : > { %3469 = shalt.err (!%p3466_p11)
}
 0x659   : > { %2971 = dma.vmem_to_hbm [thread:$0]  (%p3635_p5), %s4185_s26, 2048, %s4183_s28, %s2406_s15, %s3539_s21, %s3539_s21, %s3540_s29  }
 0x65a PF: > { %p3013_p13 = scmp.ge.s32.totalorder %s3524_s16, 2  ;;  %s2456_s11 = sand.u32 1, %s3512_s13  }
 0x65b   : > { %s2457_s25 = scalar_lea.sflag [#allocation4], %s2456_s11 }
 0x65c   : > { %p2995_p1 = pnand %p3013_p13, %p3639_p6 }
 0x65e   : > { %p2996_p2 = pneg %p2995_p1 }
 0x660   : > { %3503 = dma.done.wait (%p2996_p2), %s2457_s25, 2048  }
 0x661   : > { %3505 = vsyncadd (%p2996_p2), %s2457_s25, 4294965248  ;;  %s2466_s18 = scalar_lea.sflag [#allocation15], %s2456_s11 }
 0x662   : > { %3507 = dma.done.wait (%p2996_p2), %s2466_s18, 2048  }
 0x663   : > { %3509 = vsyncadd (%p2996_p2), %s2466_s18, 4294965248  ;;  %s4266_s16 = sld [smem:[#allocation23_spill]]  ;;  %s4269_s13 = smov %s3516_s14 }
 0x664   : > { %s4267_s23 = sld [smem:[#allocation22_spill]] }
 0x665   : > { %s4268_s15 = sld [smem:[#allocation24_spill]] }
 0x669   : > { %p28_p5 = scmp.ge.s32.totalorder %s4266_s16, 4  }
 0x66a   : > { %s4270_s14 = smov %s4267_s23 }
 0x66b   :  { %30 = sbr.rel (!%p28_p5) target bundleno = 9 (0x9), region = 138 }
 0x670   :  { %2471 = vsyncpa [#allocation3], 1 }
 0x671   :  { %2473 = vsyncpa [#allocation3 + $0x1], 1 }
 0x672   :  { %2474 = vsyncpa [#allocation6], 1 }
 0x673   :  { %2475 = vsyncpa [#allocation9], 1 }
 0x674   :  { %2476 = vsyncpa [#allocation12], 1 }
 0x675   :  { %2477 = vsyncpa [#allocation4], 1 }
 0x676   :  { %2479 = vsyncpa [#allocation4 + $0x1], 1 }
 0x677   :  { %2480 = vsyncpa [#allocation15], 1 }
 0x678   :  { %2482 = vsyncpa [#allocation15 + $0x1], 1 }

</bundles_post_ra>
